<compile_context>
chip_gen: v7x
topology: tpu7x:2x2x1
jax: 0.10.0
libtpu: 0.0.40
codegen_flags: <defaults>
</compile_context>

<pallas_src>
import functools

import jax
import jax.numpy as jnp
from jax.experimental import pallas as pl
from jax.experimental.pallas import tpu as pltpu


# ----------------------------- Pallas kernels ------------------------------ #

def _attn_kernel(x_ref, m_ref, b_ref, att_ref, acc_ref, *, inv_chw):
    """Tiled attention: acc[n,:] += x_tile @ M_tile; softmax on last CHW tile."""
    j = pl.program_id(1)

    @pl.when(j == 0)
    def _init():
        acc_ref[...] = jnp.zeros_like(acc_ref)

    acc_ref[...] += jnp.dot(x_ref[...], m_ref[...],
                            preferred_element_type=jnp.float32)

    @pl.when(j == pl.num_programs(1) - 1)
    def _finalize():
        logits = acc_ref[...] * inv_chw + b_ref[...]
        logits = logits - jnp.max(logits, axis=-1, keepdims=True)
        ex = jnp.exp(logits)
        att_ref[...] = (ex / jnp.sum(ex, axis=-1, keepdims=True)).astype(att_ref.dtype)


def _condconv_kernel(att_ref, x_ref, wexp_ref, wstat_ref, bias_ref, out_ref,
                     *, num_experts, ksize, Wp, Lout):
    """Per-sample direct conv with fused expert mixing.

    att_ref  : (N, K)        f32 SMEM          softmax attention per sample
    x_ref    : (C, Lpad)     f32 VMEM          zero-padded sample, spatial flat
    wexp_ref : (K, k*k, O, C) f32 VMEM resident expert bank, tap-major
    wstat_ref: (k*k, O, C)   f32 VMEM resident  static nn.Conv2d weight
    bias_ref : (O, 1)        f32 VMEM resident  static nn.Conv2d bias
    out_ref  : (O, Lout)     f32 VMEM           flat stride-1 output (128-padded)
    """
    n = pl.program_id(0)

    # Expert mixing on the VPU with SMEM scalars: w = w_static + sum_e att[n,e]*W_e.
    wmix = wstat_ref[...]
    for e in range(num_experts):
        wmix = wmix + att_ref[n, e] * wexp_ref[e]
    wmix = wmix.astype(jnp.bfloat16)            # MXU-native operand dtype

    # Direct conv = sum over k*k taps of lane-shifted matmuls (no im2col blowup).
    # Tap (kh, kw) is a static flat shift of kh*Wp + kw on the lane axis.
    acc = jnp.zeros(out_ref.shape, jnp.float32)
    for kh in range(ksize):
        for kw in range(ksize):
            s = kh * Wp + kw
            xs = x_ref[:, s:s + Lout].astype(jnp.bfloat16)      # (C, Lout)
            acc = acc + jnp.dot(wmix[kh * ksize + kw], xs,
                                preferred_element_type=jnp.float32)
    out_ref[...] = (acc + bias_ref[...]).astype(out_ref.dtype)


# -------------------------------- glue ------------------------------------- #

def _pool_mask(w3d, pads, spatial):
    """M[q,d,h,w] s.t. mean over all outputs of conv3d(x, w3d, padding=pads)
    equals bias[q] + <x, M[q]> / (D*H*W).  Exact for stride-1 'same' conv3d."""
    Kc = w3d.shape[0]
    kd, kh, kw = w3d.shape[2], w3d.shape[3], w3d.shape[4]
    D, H, W = spatial
    pd, ph, pw = pads
    M = jnp.zeros((Kc, D, H, W), dtype=w3d.dtype)
    for od in range(kd):
        d0, d1 = max(0, od - pd), min(D, D + od - pd)
        for oh in range(kh):
            h0, h1 = max(0, oh - ph), min(H, H + oh - ph)
            for ow in range(kw):
                w0, w1 = max(0, ow - pw), min(W, W + ow - pw)
                M = M.at[:, d0:d1, h0:h1, w0:w1].add(
                    w3d[:, 0, od, oh, ow][:, None, None, None])
    return M


def cond_conv2d_forward(x, params, *, kernel_size, stride, padding, K, groups=1):
    assert groups == 1  # TODO(synk): grouped expert conv (groups > 1) not implemented
    N, C, H, W = x.shape
    O = params["conv_w"].shape[0]
    k = kernel_size
    CHW = C * H * W

    # ---- Attention2: fold (conv3d -> adaptive avg pool) into one mask matmul ----
    M = (_pool_mask(params["att_w1"], (0, 0, 0), (C, H, W))
         + _pool_mask(params["att_w2"], (1, 1, 1), (C, H, W))
         + _pool_mask(params["att_w3"], (2, 1, 1), (C, H, W)))       # (K, C, H, W)
    m_t = M.reshape(K, CHW).T                                         # (CHW, K)
    b_att = (params["att_b1"] + params["att_b2"] + params["att_b3"]).reshape(1, K)
    x_flat = x.reshape(N, CHW)

    # Batch tile (parallel axis for v7x megacore) + CHW reduction tiles.
    TN = 8 if N % 8 == 0 else N
    TCHW = CHW
    for cand in (512, 256, 128):        # >=512-lane tiles reach ~85% HBM roofline
        if CHW % cand == 0:
            TCHW = cand
            break

    att = pl.pallas_call(
        functools.partial(_attn_kernel, inv_chw=1.0 / CHW),
        out_shape=jax.ShapeDtypeStruct((N, K), jnp.float32),
        grid=(N // TN, CHW // TCHW),
        in_specs=[
            pl.BlockSpec((TN, TCHW), lambda i, j: (i, j)),
            pl.BlockSpec((TCHW, K), lambda i, j: (j, 0)),
            pl.BlockSpec((1, K), lambda i, j: (0, 0)),
        ],
        out_specs=pl.BlockSpec((TN, K), lambda i, j: (i, 0)),
        scratch_shapes=[pltpu.VMEM((TN, K), jnp.float32)],
        compiler_params=pltpu.CompilerParams(
            dimension_semantics=("parallel", "arbitrary"),
            vmem_limit_bytes=32 * 1024 * 1024),
    )(x_flat, m_t, b_att)

    # ---- Fused dynamic+static conv, computed directly (no im2col) ------------
    # Weights pre-permuted to tap-major (k*k, O, C) so the kernel takes per-tap
    # (O, C) slices without any in-kernel reshape.
    kk = k * k
    w_exp = jnp.transpose(params["weight"], (0, 3, 4, 1, 2)).reshape(K, kk, O, C)
    w_stat = jnp.transpose(params["conv_w"], (2, 3, 0, 1)).reshape(kk, O, C)
    bias = params["conv_b"].reshape(O, 1)

    Hp, Wp = H + 2 * padding, W + 2 * padding
    Ho1, Wo1 = Hp - k + 1, Wp - k + 1            # stride-1 output extents
    Lout = ((Ho1 * Wp + 127) // 128) * 128       # lane-dense flat output length
    Lpad = Lout + (k - 1) * Wp + k               # covers every shifted read
    x_pad = jnp.pad(x, ((0, 0), (0, 0), (padding, padding), (padding, padding)))
    xf = x_pad.reshape(N, C, Hp * Wp)
    xf = jnp.pad(xf, ((0, 0), (0, 0), (0, Lpad - Hp * Wp)))

    # TODO(synk): for production-size O/C, additionally tile O and Lout (the
    # accumulator and per-sample block sizing here targets small/medium shapes).
    out_flat = pl.pallas_call(
        functools.partial(_condconv_kernel,
                          num_experts=K, ksize=k, Wp=Wp, Lout=Lout),
        out_shape=jax.ShapeDtypeStruct((N, O, Lout), jnp.float32),
        grid=(N,),
        in_specs=[
            pl.BlockSpec(memory_space=pltpu.MemorySpace.SMEM),    # att (N, K)
            pl.BlockSpec((None, C, Lpad), lambda n: (n, 0, 0)),   # per-sample x
            pl.BlockSpec((K, kk, O, C), lambda n: (0, 0, 0, 0)),  # resident experts
            pl.BlockSpec((kk, O, C), lambda n: (0, 0, 0)),        # resident static w
            pl.BlockSpec((O, 1), lambda n: (0, 0)),               # resident bias
        ],
        out_specs=pl.BlockSpec((None, O, Lout), lambda n: (n, 0, 0)),
        compiler_params=pltpu.CompilerParams(
            dimension_semantics=("parallel",),
            vmem_limit_bytes=32 * 1024 * 1024),
    )(att, xf, w_exp, w_stat, bias)

    # Un-flatten: valid outputs live at x < Wo1 of each Wp-wide flat row.
    y = out_flat[:, :, :Ho1 * Wp].reshape(N, O, Ho1, Wp)[:, :, :, :Wo1]
    if stride > 1:
        # TODO(synk): stride>1 computes the stride-1 output and subsamples; a
        # strided-gather variant would avoid the extra compute.
        y = y[:, :, ::stride, ::stride]
    return y


# ------------------------- deterministic parameters ------------------------ #

def init_params(key, in_planes, out_planes, kernel_size, K):
    ks = jax.random.split(key, 9)

    def nrm(kk, shape, scale):
        return scale * jax.random.normal(kk, shape, dtype=jnp.float32)

    C, O, ksz = in_planes, out_planes, kernel_size
    return dict(
        # Attention2: Conv3d(1,K,1), Conv3d(1,K,3,pad=1), Conv3d(1,K,(5,3,3),pad=(2,1,1))
        att_w1=nrm(ks[0], (K, 1, 1, 1, 1), 1.0),
        att_b1=nrm(ks[1], (K,), 0.1),
        att_w2=nrm(ks[2], (K, 1, 3, 3, 3), 1.0 / 27 ** 0.5),
        att_b2=nrm(ks[3], (K,), 0.1),
        att_w3=nrm(ks[4], (K, 1, 5, 3, 3), 1.0 / 45 ** 0.5),
        att_b3=nrm(ks[5], (K,), 0.1),
        # CondConv2d expert bank: torch.randn(K, O, C, k, k)
        weight=nrm(ks[6], (K, O, C, ksz, ksz), 1.0),
        # static nn.Conv2d(C, O, k)
        conv_w=nrm(ks[7], (O, C, ksz, ksz), 1.0 / (C * ksz * ksz) ** 0.5),
        conv_b=nrm(ks[8], (O,), 0.1),
    )


if __name__ == "__main__":
    key = jax.random.PRNGKey(0)
    kx, kp = jax.random.split(key)

    N, C, H, W = 2, 4, 16, 16
    O, ksz, K = 8, 3, 4

    x = jax.random.normal(kx, (N, C, H, W), dtype=jnp.float32)
    params = init_params(kp, C, O, ksz, K)

    fwd = jax.jit(functools.partial(cond_conv2d_forward,
                                    kernel_size=ksz, stride=1, padding=1, K=K))
    out = fwd(x, params)
    jax.block_until_ready(out)
    assert out.shape == (N, O, H, W), out.shape
    assert out.dtype == jnp.float32
    assert bool(jnp.isfinite(out).all())
    print("KERNEL_OK")
</pallas_src>

<mosaic_0001>
module attributes {stable_mosaic.version = 11 : i64} {
  func.func @_attn_kernel(%arg0: i32, %arg1: i32, %arg2: memref<2x512xf32, #tpu.memory_space<vmem>>, %arg3: memref<512x4xf32, #tpu.memory_space<vmem>>, %arg4: memref<1x4xf32, #tpu.memory_space<vmem>>, %arg5: memref<2x4xf32, #tpu.memory_space<vmem>>, %arg6: memref<2x4xf32, #tpu.memory_space<vmem>>) attributes {dimension_semantics = [#tpu.dimension_semantics<parallel>, #tpu.dimension_semantics<arbitrary>], iteration_bounds = array<i64: 1, 2>, scalar_prefetch = 0 : i64, scratch_operands = 1 : i64, tpu.core_type = #tpu.core_type<tc>, window_params = [{transform_indices = @transform_0, window_bounds = array<i64: 2, 512>}, {transform_indices = @transform_1, window_bounds = array<i64: 512, 4>}, {pipeline_mode = #tpu.pipeline_mode<synchronous>, transform_indices = @transform_2, window_bounds = array<i64: 1, 4>}, {transform_indices = @transform_3, window_bounds = array<i64: 2, 4>}]} {
    %c0_i32 = arith.constant 0 : i32
    %0 = arith.cmpi eq, %arg1, %c0_i32 : i32
    %1 = arith.extui %0 : i1 to i32
    %c0_i32_0 = arith.constant 0 : i32
    %2 = arith.cmpi ne, %1, %c0_i32_0 : i32
    scf.if %2 {
      %cst_9 = arith.constant 0.000000e+00 : f32
      %12 = vector.broadcast %cst_9 : f32 to vector<2x4xf32>
      %c0_10 = arith.constant 0 : index
      %c0_11 = arith.constant 0 : index
      %13 = vector.load %arg6[%c0_10, %c0_11] : memref<2x4xf32, #tpu.memory_space<vmem>>, vector<2x4xf32>
      tpu.vector_store %arg6[%c0_10, %c0_11], %12 {strides = array<i32>} : memref<2x4xf32, #tpu.memory_space<vmem>>, vector<2x4xf32>,
    } else {
    }
    %c0 = arith.constant 0 : index
    %c0_1 = arith.constant 0 : index
    %3 = vector.load %arg6[%c0, %c0_1] : memref<2x4xf32, #tpu.memory_space<vmem>>, vector<2x4xf32>
    %c0_2 = arith.constant 0 : index
    %c0_3 = arith.constant 0 : index
    %4 = vector.load %arg2[%c0_2, %c0_3] : memref<2x512xf32, #tpu.memory_space<vmem>>, vector<2x512xf32>
    %c0_4 = arith.constant 0 : index
    %c0_5 = arith.constant 0 : index
    %5 = vector.load %arg3[%c0_4, %c0_5] : memref<512x4xf32, #tpu.memory_space<vmem>>, vector<512x4xf32>
    %cst = arith.constant dense<0.000000e+00> : vector<2x4xf32>
    %6 = tpu.matmul %4, %5, %cst {dimension_numbers = #tpu.dot_dimension_numbers<[1], [0], [0], [1], [0, 0, 1, 1], [], []>} : vector<2x512xf32>, vector<512x4xf32>, vector<2x4xf32> -> vector<2x4xf32>
    %7 = arith.addf %3, %6 : vector<2x4xf32>
    %c0_6 = arith.constant 0 : index
    %c0_7 = arith.constant 0 : index
    %8 = vector.load %arg6[%c0_6, %c0_7] : memref<2x4xf32, #tpu.memory_space<vmem>>, vector<2x4xf32>
    tpu.vector_store %arg6[%c0_6, %c0_7], %7 {strides = array<i32>} : memref<2x4xf32, #tpu.memory_space<vmem>>, vector<2x4xf32>,
    %c1_i32 = arith.constant 1 : i32
    %9 = arith.cmpi eq, %arg1, %c1_i32 : i32
    %10 = arith.extui %9 : i1 to i32
    %c0_i32_8 = arith.constant 0 : i32
    %11 = arith.cmpi ne, %10, %c0_i32_8 : i32
    scf.if %11 {
      %c0_9 = arith.constant 0 : index
      %c0_10 = arith.constant 0 : index
      %12 = vector.load %arg6[%c0_9, %c0_10] : memref<2x4xf32, #tpu.memory_space<vmem>>, vector<2x4xf32>
      %cst_11 = arith.constant 9.765625E-4 : f32
      %13 = vector.broadcast %cst_11 : f32 to vector<2x4xf32>
      %14 = arith.mulf %12, %13 : vector<2x4xf32>
      %c0_12 = arith.constant 0 : index
      %c0_13 = arith.constant 0 : index
      %15 = vector.load %arg4[%c0_12, %c0_13] : memref<1x4xf32, #tpu.memory_space<vmem>>, vector<1x4xf32>
      %16 = vector.broadcast %15 : vector<1x4xf32> to vector<2x4xf32>
      %17 = arith.addf %14, %16 : vector<2x4xf32>
      %cst_14 = arith.constant dense<0xFF800000> : vector<2xf32>
      %18 = vector.multi_reduction <maximumf>, %17, %cst_14 [1] : vector<2x4xf32> to vector<2xf32>
      %19 = vector.shape_cast %18 : vector<2xf32> to vector<2x1xf32>
      %20 = vector.broadcast %19 : vector<2x1xf32> to vector<2x4xf32>
      %21 = arith.subf %17, %20 : vector<2x4xf32>
      %22 = math.exp %21 : vector<2x4xf32>
      %cst_15 = arith.constant dense<0.000000e+00> : vector<2xf32>
      %23 = vector.multi_reduction <add>, %22, %cst_15 [1] : vector<2x4xf32> to vector<2xf32>
      %24 = vector.shape_cast %23 : vector<2xf32> to vector<2x1xf32>
      %25 = vector.broadcast %24 : vector<2x1xf32> to vector<2x4xf32>
      %26 = arith.divf %22, %25 : vector<2x4xf32>
      %c0_16 = arith.constant 0 : index
      %c0_17 = arith.constant 0 : index
      %27 = vector.load %arg5[%c0_16, %c0_17] : memref<2x4xf32, #tpu.memory_space<vmem>>, vector<2x4xf32>
      tpu.vector_store %arg5[%c0_16, %c0_17], %26 {strides = array<i32>} : memref<2x4xf32, #tpu.memory_space<vmem>>, vector<2x4xf32>,
    } else {
    }
    return
  }
  func.func @transform_0(%arg0: i32, %arg1: i32) -> (i32, i32) {
    %c0_i32 = arith.constant 0 : i32
    return %arg0, %arg1 : i32, i32
  }
  func.func @transform_1(%arg0: i32, %arg1: i32) -> (i32, i32) {
    %c0_i32 = arith.constant 0 : i32
    %c0_i32_0 = arith.constant 0 : i32
    return %arg1, %c0_i32 : i32, i32
  }
  func.func @transform_2(%arg0: i32, %arg1: i32) -> (i32, i32) {
    %c0_i32 = arith.constant 0 : i32
    %c0_i32_0 = arith.constant 0 : i32
    %c0_i32_1 = arith.constant 0 : i32
    return %c0_i32, %c0_i32_0 : i32, i32
  }
  func.func @transform_3(%arg0: i32, %arg1: i32) -> (i32, i32) {
    %c0_i32 = arith.constant 0 : i32
    %c0_i32_0 = arith.constant 0 : i32
    return %arg0, %c0_i32 : i32, i32
  }
}

module attributes {stable_mosaic.version = 11 : i64} {
  func.func @_condconv_kernel(%arg0: i32, %arg1: memref<2x4xf32, #tpu.memory_space<smem>>, %arg2: memref<1x4x423xf32, #tpu.memory_space<vmem>>, %arg3: memref<4x9x8x4xf32, #tpu.memory_space<vmem>>, %arg4: memref<9x8x4xf32, #tpu.memory_space<vmem>>, %arg5: memref<8x1xf32, #tpu.memory_space<vmem>>, %arg6: memref<1x8x384xf32, #tpu.memory_space<vmem>>) attributes {dimension_semantics = [#tpu.dimension_semantics<parallel>], iteration_bounds = array<i64: 2>, scalar_prefetch = 0 : i64, scratch_operands = 0 : i64, tpu.core_type = #tpu.core_type<tc>, window_params = [{transform_indices = @transform_0, window_bounds = array<i64: 2, 4>}, {transform_indices = @transform_1, window_bounds = array<i64: 1, 4, 423>}, {pipeline_mode = #tpu.pipeline_mode<synchronous>, transform_indices = @transform_2, window_bounds = array<i64: 4, 9, 8, 4>}, {pipeline_mode = #tpu.pipeline_mode<synchronous>, transform_indices = @transform_3, window_bounds = array<i64: 9, 8, 4>}, {pipeline_mode = #tpu.pipeline_mode<synchronous>, transform_indices = @transform_4, window_bounds = array<i64: 8, 1>}, {transform_indices = @transform_5, window_bounds = array<i64: 1, 8, 384>}]} {
    %c0 = arith.constant 0 : index
    %c0_0 = arith.constant 0 : index
    %c0_1 = arith.constant 0 : index
    %0 = vector.load %arg4[%c0, %c0_0, %c0_1] : memref<9x8x4xf32, #tpu.memory_space<vmem>>, vector<9x8x4xf32>
    %1 = arith.index_cast %arg0 : i32 to index
    %c0_2 = arith.constant 0 : index
    %2 = memref.load %arg1[%1, %c0_2] : memref<2x4xf32, #tpu.memory_space<smem>>
    %c0_3 = arith.constant 0 : index
    %c0_4 = arith.constant 0 : index
    %c0_5 = arith.constant 0 : index
    %c0_6 = arith.constant 0 : index
    %3 = vector.load %arg3[%c0_3, %c0_4, %c0_5, %c0_6] : memref<4x9x8x4xf32, #tpu.memory_space<vmem>>, vector<1x9x8x4xf32>
    %4 = vector.shape_cast %3 : vector<1x9x8x4xf32> to vector<9x8x4xf32>
    %5 = vector.broadcast %2 : f32 to vector<9x8x4xf32>
    %6 = arith.mulf %5, %4 : vector<9x8x4xf32>
    %7 = arith.addf %0, %6 : vector<9x8x4xf32>
    %8 = arith.index_cast %arg0 : i32 to index
    %c1 = arith.constant 1 : index
    %9 = memref.load %arg1[%8, %c1] : memref<2x4xf32, #tpu.memory_space<smem>>
    %c1_7 = arith.constant 1 : index
    %c0_8 = arith.constant 0 : index
    %c0_9 = arith.constant 0 : index
    %c0_10 = arith.constant 0 : index
    %10 = vector.load %arg3[%c1_7, %c0_8, %c0_9, %c0_10] : memref<4x9x8x4xf32, #tpu.memory_space<vmem>>, vector<1x9x8x4xf32>
    %11 = vector.shape_cast %10 : vector<1x9x8x4xf32> to vector<9x8x4xf32>
    %12 = vector.broadcast %9 : f32 to vector<9x8x4xf32>
    %13 = arith.mulf %12, %11 : vector<9x8x4xf32>
    %14 = arith.addf %7, %13 : vector<9x8x4xf32>
    %15 = arith.index_cast %arg0 : i32 to index
    %c2 = arith.constant 2 : index
    %16 = memref.load %arg1[%15, %c2] : memref<2x4xf32, #tpu.memory_space<smem>>
    %c2_11 = arith.constant 2 : index
    %c0_12 = arith.constant 0 : index
    %c0_13 = arith.constant 0 : index
    %c0_14 = arith.constant 0 : index
    %17 = vector.load %arg3[%c2_11, %c0_12, %c0_13, %c0_14] : memref<4x9x8x4xf32, #tpu.memory_space<vmem>>, vector<1x9x8x4xf32>
    %18 = vector.shape_cast %17 : vector<1x9x8x4xf32> to vector<9x8x4xf32>
    %19 = vector.broadcast %16 : f32 to vector<9x8x4xf32>
    %20 = arith.mulf %19, %18 : vector<9x8x4xf32>
    %21 = arith.addf %14, %20 : vector<9x8x4xf32>
    %22 = arith.index_cast %arg0 : i32 to index
    %c3 = arith.constant 3 : index
    %23 = memref.load %arg1[%22, %c3] : memref<2x4xf32, #tpu.memory_space<smem>>
    %c3_15 = arith.constant 3 : index
    %c0_16 = arith.constant 0 : index
    %c0_17 = arith.constant 0 : index
    %c0_18 = arith.constant 0 : index
    %24 = vector.load %arg3[%c3_15, %c0_16, %c0_17, %c0_18] : memref<4x9x8x4xf32, #tpu.memory_space<vmem>>, vector<1x9x8x4xf32>
    %25 = vector.shape_cast %24 : vector<1x9x8x4xf32> to vector<9x8x4xf32>
    %26 = vector.broadcast %23 : f32 to vector<9x8x4xf32>
    %27 = arith.mulf %26, %25 : vector<9x8x4xf32>
    %28 = arith.addf %21, %27 : vector<9x8x4xf32>
    %29 = arith.truncf %28 : vector<9x8x4xf32> to vector<9x8x4xbf16>
    %cst = arith.constant 0.000000e+00 : f32
    %30 = vector.broadcast %cst : f32 to vector<8x384xf32>
    %c0_19 = arith.constant 0 : index
    %c0_20 = arith.constant 0 : index
    %c0_21 = arith.constant 0 : index
    %31 = vector.load %arg2[%c0_19, %c0_20, %c0_21] : memref<1x4x423xf32, #tpu.memory_space<vmem>>, vector<1x4x384xf32>
    %32 = vector.shape_cast %31 : vector<1x4x384xf32> to vector<4x384xf32>
    %33 = arith.truncf %32 : vector<4x384xf32> to vector<4x384xbf16>
    %34 = vector.extract_strided_slice %29 {offsets = [0, 0, 0], sizes = [1, 8, 4], strides = [1, 1, 1]} : vector<9x8x4xbf16> to vector<1x8x4xbf16>
    %35 = vector.shape_cast %34 : vector<1x8x4xbf16> to vector<8x4xbf16>
    %cst_22 = arith.constant dense<0.000000e+00> : vector<8x384xf32>
    %36 = tpu.matmul %35, %33, %cst_22 {dimension_numbers = #tpu.dot_dimension_numbers<[1], [0], [0], [1], [0, 0, 1, 1], [], []>} : vector<8x4xbf16>, vector<4x384xbf16>, vector<8x384xf32> -> vector<8x384xf32>
    %37 = arith.addf %30, %36 : vector<8x384xf32>
    %c0_23 = arith.constant 0 : index
    %c0_24 = arith.constant 0 : index
    %c1_25 = arith.constant 1 : index
    %38 = vector.load %arg2[%c0_23, %c0_24, %c1_25] : memref<1x4x423xf32, #tpu.memory_space<vmem>>, vector<1x4x384xf32>
    %39 = vector.shape_cast %38 : vector<1x4x384xf32> to vector<4x384xf32>
    %40 = arith.truncf %39 : vector<4x384xf32> to vector<4x384xbf16>
    %41 = vector.extract_strided_slice %29 {offsets = [1, 0, 0], sizes = [1, 8, 4], strides = [1, 1, 1]} : vector<9x8x4xbf16> to vector<1x8x4xbf16>
    %42 = vector.shape_cast %41 : vector<1x8x4xbf16> to vector<8x4xbf16>
    %cst_26 = arith.constant dense<0.000000e+00> : vector<8x384xf32>
    %43 = tpu.matmul %42, %40, %cst_26 {dimension_numbers = #tpu.dot_dimension_numbers<[1], [0], [0], [1], [0, 0, 1, 1], [], []>} : vector<8x4xbf16>, vector<4x384xbf16>, vector<8x384xf32> -> vector<8x384xf32>
    %44 = arith.addf %37, %43 : vector<8x384xf32>
    %c0_27 = arith.constant 0 : index
    %c0_28 = arith.constant 0 : index
    %c2_29 = arith.constant 2 : index
    %45 = vector.load %arg2[%c0_27, %c0_28, %c2_29] : memref<1x4x423xf32, #tpu.memory_space<vmem>>, vector<1x4x384xf32>
    %46 = vector.shape_cast %45 : vector<1x4x384xf32> to vector<4x384xf32>
    %47 = arith.truncf %46 : vector<4x384xf32> to vector<4x384xbf16>
    %48 = vector.extract_strided_slice %29 {offsets = [2, 0, 0], sizes = [1, 8, 4], strides = [1, 1, 1]} : vector<9x8x4xbf16> to vector<1x8x4xbf16>
    %49 = vector.shape_cast %48 : vector<1x8x4xbf16> to vector<8x4xbf16>
    %cst_30 = arith.constant dense<0.000000e+00> : vector<8x384xf32>
    %50 = tpu.matmul %49, %47, %cst_30 {dimension_numbers = #tpu.dot_dimension_numbers<[1], [0], [0], [1], [0, 0, 1, 1], [], []>} : vector<8x4xbf16>, vector<4x384xbf16>, vector<8x384xf32> -> vector<8x384xf32>
    %51 = arith.addf %44, %50 : vector<8x384xf32>
    %c0_31 = arith.constant 0 : index
    %c0_32 = arith.constant 0 : index
    %c18 = arith.constant 18 : index
    %52 = vector.load %arg2[%c0_31, %c0_32, %c18] : memref<1x4x423xf32, #tpu.memory_space<vmem>>, vector<1x4x384xf32>
    %53 = vector.shape_cast %52 : vector<1x4x384xf32> to vector<4x384xf32>
    %54 = arith.truncf %53 : vector<4x384xf32> to vector<4x384xbf16>
    %55 = vector.extract_strided_slice %29 {offsets = [3, 0, 0], sizes = [1, 8, 4], strides = [1, 1, 1]} : vector<9x8x4xbf16> to vector<1x8x4xbf16>
    %56 = vector.shape_cast %55 : vector<1x8x4xbf16> to vector<8x4xbf16>
    %cst_33 = arith.constant dense<0.000000e+00> : vector<8x384xf32>
    %57 = tpu.matmul %56, %54, %cst_33 {dimension_numbers = #tpu.dot_dimension_numbers<[1], [0], [0], [1], [0, 0, 1, 1], [], []>} : vector<8x4xbf16>, vector<4x384xbf16>, vector<8x384xf32> -> vector<8x384xf32>
    %58 = arith.addf %51, %57 : vector<8x384xf32>
    %c0_34 = arith.constant 0 : index
    %c0_35 = arith.constant 0 : index
    %c19 = arith.constant 19 : index
    %59 = vector.load %arg2[%c0_34, %c0_35, %c19] : memref<1x4x423xf32, #tpu.memory_space<vmem>>, vector<1x4x384xf32>
    %60 = vector.shape_cast %59 : vector<1x4x384xf32> to vector<4x384xf32>
    %61 = arith.truncf %60 : vector<4x384xf32> to vector<4x384xbf16>
    %62 = vector.extract_strided_slice %29 {offsets = [4, 0, 0], sizes = [1, 8, 4], strides = [1, 1, 1]} : vector<9x8x4xbf16> to vector<1x8x4xbf16>
    %63 = vector.shape_cast %62 : vector<1x8x4xbf16> to vector<8x4xbf16>
    %cst_36 = arith.constant dense<0.000000e+00> : vector<8x384xf32>
    %64 = tpu.matmul %63, %61, %cst_36 {dimension_numbers = #tpu.dot_dimension_numbers<[1], [0], [0], [1], [0, 0, 1, 1], [], []>} : vector<8x4xbf16>, vector<4x384xbf16>, vector<8x384xf32> -> vector<8x384xf32>
    %65 = arith.addf %58, %64 : vector<8x384xf32>
    %c0_37 = arith.constant 0 : index
    %c0_38 = arith.constant 0 : index
    %c20 = arith.constant 20 : index
    %66 = vector.load %arg2[%c0_37, %c0_38, %c20] : memref<1x4x423xf32, #tpu.memory_space<vmem>>, vector<1x4x384xf32>
    %67 = vector.shape_cast %66 : vector<1x4x384xf32> to vector<4x384xf32>
    %68 = arith.truncf %67 : vector<4x384xf32> to vector<4x384xbf16>
    %69 = vector.extract_strided_slice %29 {offsets = [5, 0, 0], sizes = [1, 8, 4], strides = [1, 1, 1]} : vector<9x8x4xbf16> to vector<1x8x4xbf16>
    %70 = vector.shape_cast %69 : vector<1x8x4xbf16> to vector<8x4xbf16>
    %cst_39 = arith.constant dense<0.000000e+00> : vector<8x384xf32>
    %71 = tpu.matmul %70, %68, %cst_39 {dimension_numbers = #tpu.dot_dimension_numbers<[1], [0], [0], [1], [0, 0, 1, 1], [], []>} : vector<8x4xbf16>, vector<4x384xbf16>, vector<8x384xf32> -> vector<8x384xf32>
    %72 = arith.addf %65, %71 : vector<8x384xf32>
    %c0_40 = arith.constant 0 : index
    %c0_41 = arith.constant 0 : index
    %c36 = arith.constant 36 : index
    %73 = vector.load %arg2[%c0_40, %c0_41, %c36] : memref<1x4x423xf32, #tpu.memory_space<vmem>>, vector<1x4x384xf32>
    %74 = vector.shape_cast %73 : vector<1x4x384xf32> to vector<4x384xf32>
    %75 = arith.truncf %74 : vector<4x384xf32> to vector<4x384xbf16>
    %76 = vector.extract_strided_slice %29 {offsets = [6, 0, 0], sizes = [1, 8, 4], strides = [1, 1, 1]} : vector<9x8x4xbf16> to vector<1x8x4xbf16>
    %77 = vector.shape_cast %76 : vector<1x8x4xbf16> to vector<8x4xbf16>
    %cst_42 = arith.constant dense<0.000000e+00> : vector<8x384xf32>
    %78 = tpu.matmul %77, %75, %cst_42 {dimension_numbers = #tpu.dot_dimension_numbers<[1], [0], [0], [1], [0, 0, 1, 1], [], []>} : vector<8x4xbf16>, vector<4x384xbf16>, vector<8x384xf32> -> vector<8x384xf32>
    %79 = arith.addf %72, %78 : vector<8x384xf32>
    %c0_43 = arith.constant 0 : index
    %c0_44 = arith.constant 0 : index
    %c37 = arith.constant 37 : index
    %80 = vector.load %arg2[%c0_43, %c0_44, %c37] : memref<1x4x423xf32, #tpu.memory_space<vmem>>, vector<1x4x384xf32>
    %81 = vector.shape_cast %80 : vector<1x4x384xf32> to vector<4x384xf32>
    %82 = arith.truncf %81 : vector<4x384xf32> to vector<4x384xbf16>
    %83 = vector.extract_strided_slice %29 {offsets = [7, 0, 0], sizes = [1, 8, 4], strides = [1, 1, 1]} : vector<9x8x4xbf16> to vector<1x8x4xbf16>
    %84 = vector.shape_cast %83 : vector<1x8x4xbf16> to vector<8x4xbf16>
    %cst_45 = arith.constant dense<0.000000e+00> : vector<8x384xf32>
    %85 = tpu.matmul %84, %82, %cst_45 {dimension_numbers = #tpu.dot_dimension_numbers<[1], [0], [0], [1], [0, 0, 1, 1], [], []>} : vector<8x4xbf16>, vector<4x384xbf16>, vector<8x384xf32> -> vector<8x384xf32>
    %86 = arith.addf %79, %85 : vector<8x384xf32>
    %c0_46 = arith.constant 0 : index
    %c0_47 = arith.constant 0 : index
    %c38 = arith.constant 38 : index
    %87 = vector.load %arg2[%c0_46, %c0_47, %c38] : memref<1x4x423xf32, #tpu.memory_space<vmem>>, vector<1x4x384xf32>
    %88 = vector.shape_cast %87 : vector<1x4x384xf32> to vector<4x384xf32>
    %89 = arith.truncf %88 : vector<4x384xf32> to vector<4x384xbf16>
    %90 = vector.extract_strided_slice %29 {offsets = [8, 0, 0], sizes = [1, 8, 4], strides = [1, 1, 1]} : vector<9x8x4xbf16> to vector<1x8x4xbf16>
    %91 = vector.shape_cast %90 : vector<1x8x4xbf16> to vector<8x4xbf16>
    %cst_48 = arith.constant dense<0.000000e+00> : vector<8x384xf32>
    %92 = tpu.matmul %91, %89, %cst_48 {dimension_numbers = #tpu.dot_dimension_numbers<[1], [0], [0], [1], [0, 0, 1, 1], [], []>} : vector<8x4xbf16>, vector<4x384xbf16>, vector<8x384xf32> -> vector<8x384xf32>
    %93 = arith.addf %86, %92 : vector<8x384xf32>
    %c0_49 = arith.constant 0 : index
    %c0_50 = arith.constant 0 : index
    %94 = vector.load %arg5[%c0_49, %c0_50] : memref<8x1xf32, #tpu.memory_space<vmem>>, vector<8x1xf32>
    %95 = vector.broadcast %94 : vector<8x1xf32> to vector<8x384xf32>
    %96 = arith.addf %93, %95 : vector<8x384xf32>
    %c0_51 = arith.constant 0 : index
    %c0_52 = arith.constant 0 : index
    %c0_53 = arith.constant 0 : index
    %97 = vector.load %arg6[%c0_51, %c0_52, %c0_53] : memref<1x8x384xf32, #tpu.memory_space<vmem>>, vector<1x8x384xf32>
    %98 = vector.shape_cast %97 : vector<1x8x384xf32> to vector<8x384xf32>
    %99 = vector.shape_cast %96 : vector<8x384xf32> to vector<1x8x384xf32>
    tpu.vector_store %arg6[%c0_51, %c0_52, %c0_53], %99 {strides = array<i32>} : memref<1x8x384xf32, #tpu.memory_space<vmem>>, vector<1x8x384xf32>,
    return
  }
  func.func @transform_0(%arg0: i32) -> (i32, i32) {
    %c0_i32 = arith.constant 0 : i32
    %c0_i32_0 = arith.constant 0 : i32
    %c0_i32_1 = arith.constant 0 : i32
    return %c0_i32, %c0_i32_0 : i32, i32
  }
  func.func @transform_1(%arg0: i32) -> (i32, i32, i32) {
    %c0_i32 = arith.constant 0 : i32
    %c0_i32_0 = arith.constant 0 : i32
    %c0_i32_1 = arith.constant 0 : i32
    return %arg0, %c0_i32, %c0_i32_0 : i32, i32, i32
  }
  func.func @transform_2(%arg0: i32) -> (i32, i32, i32, i32) {
    %c0_i32 = arith.constant 0 : i32
    %c0_i32_0 = arith.constant 0 : i32
    %c0_i32_1 = arith.constant 0 : i32
    %c0_i32_2 = arith.constant 0 : i32
    %c0_i32_3 = arith.constant 0 : i32
    return %c0_i32, %c0_i32_0, %c0_i32_1, %c0_i32_2 : i32, i32, i32, i32
  }
  func.func @transform_3(%arg0: i32) -> (i32, i32, i32) {
    %c0_i32 = arith.constant 0 : i32
    %c0_i32_0 = arith.constant 0 : i32
    %c0_i32_1 = arith.constant 0 : i32
    %c0_i32_2 = arith.constant 0 : i32
    return %c0_i32, %c0_i32_0, %c0_i32_1 : i32, i32, i32
  }
  func.func @transform_4(%arg0: i32) -> (i32, i32) {
    %c0_i32 = arith.constant 0 : i32
    %c0_i32_0 = arith.constant 0 : i32
    %c0_i32_1 = arith.constant 0 : i32
    return %c0_i32, %c0_i32_0 : i32, i32
  }
  func.func @transform_5(%arg0: i32) -> (i32, i32, i32) {
    %c0_i32 = arith.constant 0 : i32
    %c0_i32_0 = arith.constant 0 : i32
    %c0_i32_1 = arith.constant 0 : i32
    return %arg0, %c0_i32, %c0_i32_0 : i32, i32, i32
  }
}

</mosaic_0001>

<bundles_post_ra>
// kernel: cond_conv2d_forward.2
= control target key start
LH: loop header
LB: loop body
LE: loop exit
PB: predicated region body
PF: predicated region fallthrough
CT: control target
= control target key end

     0   :  { %s784_s12 = smov 0   ;;  %s786_s13 = smov 0   ;;  %s902_s0 = inlined_call_operand.vmem [shape: f32[2,1024], index: 0, kind: input, shape index: {}]   ;;  %s903_s1 = inlined_call_operand.vmem [shape: f32[1024,4], index: 1, kind: input, shape index: {}]   ;;  %s904_s2 = inlined_call_operand.vmem [shape: f32[1,4], index: 2, kind: input, shape index: {}]   ;;  %s905_s3 = inlined_call_operand.vmem [shape: f32[2,4], index: 3, kind: output, shape index: {}]  }
   0x1   :  { %s788_s14 = smov 0  }
   0x2 LB: > { %s22_s15 = sadd.s32 1, %s756_s13  ;;  %p562_p0 = scmp.ge.s32.totalorder %s760_s14, 1  ;;  %s760_s14 = sphi %s788_s14, %s13_s14   ;;  %s756_s13 = sphi %s786_s13, %s907_s13   ;;  %s752_s12 = sphi %s784_s12, %s906_s12  }
   0x3   : > { %p23_p1 = scmp.ge.s32.totalorder %s22_s15, 2  ;;  %p167_p2 = scmp.lt.s32.totalorder %s760_s14, 3 }
   0x5   : > { %s909_s15 = smov (%p23_p1, %s22_s15), 0  ;;  %p168_p3 = pnand %p562_p0, %p167_p2 }
   0x6   : > { %s563_s16 = sshll.u32 (!%p168_p3), %s752_s12, 2  ;;  %s565_s17 = sshll.u32 (!%p168_p3), %s752_s12, 6 }
   0x7   : > { %171 = sbr.rel (%p168_p3) target bundleno = 607 (0x25f), region = 32  ;;  %p202_p4 = scmp.lt.s32.totalorder (!%p168_p3), %s563_s16, 7 }
   0x8   : > { %p210_p5 = scmp.lt.s32.totalorder (!%p168_p3), %s565_s17, 127  ;;  %p567_p6 = scmp.ne.s32.totalorder (!%p168_p3), %s752_s12, 0 }
   0xe   : > { %s911_s16 = smov (!%p202_p4, %s563_s16), 7  ;;  %s913_s17 = smov (!%p210_p5, %s565_s17), 127 }
   0xf   : > { %s564_s18 = sshll.u32 %s911_s16, 1  ;;  %s566_s22 = sshll.u32 %s913_s17, 3  ;;  %vm223_vm0 = vcmask (!%p567_p6), 25600   ;;  %v762_v0 = vmov (!%p567_p6), 0.0  }
  0x10   : > { %s809_s21 = scalar_lea.vmem %s902_s0, %s564_s18  ;;  %s814_s25 = scalar_lea.vmem %s903_s1, %s566_s22  ;;  %224 = vst.msk [vmem:[#allocation2] sm:$0x3] (!%p567_p6), %vm223_vm0, %v762_v0 }
  0x11   : > { %222 = sbr.rel (%p567_p6) target bundleno = 24 (0x18), region = 36 }
  0x18 PF: > { %v243_v1 = vld [vmem:[%s814_s25 + $0x80] sm:$0xff]  ;;  %v244_v2 = vld [vmem:[%s814_s25 + $0x88] sm:$0xff]  ;;  %v245_v12 = vld [vmem:[%s814_s25 + $0x90] sm:$0xff]  ;;  %v763_v48 = vmov 1983009808   ;;  %v296_v50 = vlaneseq  ;;  %vm454_vm1 = vcmask 25600  }
  0x19   : > { %v275_v3 = vld [vmem:[%s814_s25 + $0x180] sm:$0xff]  ;;  %v643_v4 = vpack.c.bf16 %v244_v2, %v243_v1  ;;  %v276_v5 = vld [vmem:[%s814_s25 + $0x188] sm:$0xff]  ;;  %v246_v14 = vld [vmem:[%s814_s25 + $0x98] sm:$0xff]  ;;  %v294_v49 = vunpack.c.l.s4 %v763_v48  ;;  %p568_p7 = scmp.ne.s32.totalorder %s752_s12, 1 }
  0x1a   : > { %v227_v6 = vld [vmem:[%s814_s25] sm:$0xff]  ;;  %v228_v7 = vld [vmem:[%s814_s25 + $0x8] sm:$0xff]  ;;  %v675_v8 = vpack.c.bf16 %v276_v5, %v275_v3  ;;  %v277_v15 = vld [vmem:[%s814_s25 + $0x190] sm:$0xff]  ;;  %v647_v17 = vpack.c.bf16 %v246_v14, %v245_v12  ;;  %v297_v1 = vshrl.u32 %v296_v50, 7 }
  0x1b   : > { %v645_v9 = vpack.c.bf16 %v228_v7, %v227_v6  ;;  %v259_v10 = vld [vmem:[%s814_s25 + $0x100] sm:$0xff]  ;;  %v260_v11 = vld [vmem:[%s814_s25 + $0x108] sm:$0xff]  ;;  %644 = vmatprep.subr.bf16.mxu0 %v643_v4  ;;  %v278_v16 = vld [vmem:[%s814_s25 + $0x198] sm:$0xff]  ;;  %v295_v0 = vunpack.c.0.s8 %v294_v49 }
  0x1c   : > { %v677_v13 = vpack.c.bf16 %v260_v11, %v259_v10  ;;  %676 = vmatprep.subr.bf16.mxu1 %v675_v8  ;;  %v679_v18 = vpack.c.bf16 %v278_v16, %v277_v15  ;;  %v229_v19 = vld [vmem:[%s814_s25 + $0x10] sm:$0xff]  ;;  %v230_v20 = vld [vmem:[%s814_s25 + $0x18] sm:$0xff]  ;;  %v247_v24 = vld [vmem:[%s814_s25 + $0xa0] sm:$0xff] }
  0x1d   : > { %646 = vmatpush3.bf16.msra.mxu0 %v645_v9  ;;  %v261_v21 = vld [vmem:[%s814_s25 + $0x110] sm:$0xff]  ;;  %v649_v22 = vpack.c.bf16 %v230_v20, %v229_v19  ;;  %v262_v23 = vld [vmem:[%s814_s25 + $0x118] sm:$0xff]  ;;  %v248_v25 = vld [vmem:[%s814_s25 + $0xa8] sm:$0xff]  ;;  %v298_v14 = vsub.s32 %v295_v0, %v297_v1 }
  0x1e   : > { %678 = vmatpush3.bf16.msra.mxu1 %v677_v13  ;;  %648 = vmatprep.subr.bf16.mxu0 %v647_v17  ;;  %v681_v26 = vpack.c.bf16 %v262_v23, %v261_v21  ;;  %v651_v27 = vpack.c.bf16 %v248_v25, %v247_v24  ;;  %v279_v28 = vld [vmem:[%s814_s25 + $0x1a0] sm:$0xff]  ;;  %v280_v29 = vld [vmem:[%s814_s25 + $0x1a8] sm:$0xff]  ;;  %v249_v36 = vld [vmem:[%s814_s25 + $0xb0] sm:$0xff] }
  0x1f   : > { %680 = vmatprep.subr.bf16.mxu1 %v679_v18  ;;  %v231_v30 = vld [vmem:[%s814_s25 + $0x20] sm:$0xff]  ;;  %v683_v31 = vpack.c.bf16 %v280_v29, %v279_v28  ;;  %v232_v32 = vld [vmem:[%s814_s25 + $0x28] sm:$0xff]  ;;  %v250_v37 = vld [vmem:[%s814_s25 + $0xb8] sm:$0xff] }
  0x20   : > { %v263_v33 = vld [vmem:[%s814_s25 + $0x120] sm:$0xff]  ;;  %v264_v34 = vld [vmem:[%s814_s25 + $0x128] sm:$0xff]  ;;  %v653_v35 = vpack.c.bf16 %v232_v32, %v231_v30  ;;  %v281_v38 = vld [vmem:[%s814_s25 + $0x1b0] sm:$0xff]  ;;  %v655_v40 = vpack.c.bf16 %v250_v37, %v249_v36 }
  0x21   : > { %650 = vmatpush3.bf16.msra.mxu0 %v649_v22  ;;  %v685_v39 = vpack.c.bf16 %v264_v34, %v263_v33  ;;  %v282_v41 = vld [vmem:[%s814_s25 + $0x1b8] sm:$0xff]  ;;  %v233_v42 = vld [vmem:[%s814_s25 + $0x30] sm:$0xff]  ;;  %v251_v47 = vld [vmem:[%s814_s25 + $0xc0] sm:$0xff] }
  0x22   : > { %682 = vmatpush3.bf16.msra.mxu1 %v681_v26  ;;  %652 = vmatprep.subr.bf16.mxu0 %v651_v27  ;;  %v234_v43 = vld [vmem:[%s814_s25 + $0x38] sm:$0xff]  ;;  %v687_v44 = vpack.c.bf16 %v282_v41, %v281_v38  ;;  %v265_v45 = vld [vmem:[%s814_s25 + $0x130] sm:$0xff]  ;;  %v252_v51 = vld [vmem:[%s814_s25 + $0xc8] sm:$0xff] }
  0x23   : > { %684 = vmatprep.subr.bf16.mxu1 %v683_v31  ;;  %v266_v46 = vld [vmem:[%s814_s25 + $0x138] sm:$0xff]  ;;  %v283_v52 = vld [vmem:[%s814_s25 + $0x1c0] sm:$0xff]  ;;  %v284_v53 = vld [vmem:[%s814_s25 + $0x1c8] sm:$0xff]  ;;  %v657_v54 = vpack.c.bf16 %v234_v43, %v233_v42  ;;  %v659_v56 = vpack.c.bf16 %v252_v51, %v251_v47 }
  0x24   : > { %v689_v55 = vpack.c.bf16 %v266_v46, %v265_v45  ;;  %v235_v57 = vld [vmem:[%s814_s25 + $0x40] sm:$0xff]  ;;  %v236_v58 = vld [vmem:[%s814_s25 + $0x48] sm:$0xff]  ;;  %v691_v60 = vpack.c.bf16 %v284_v53, %v283_v52  ;;  %v253_v62 = vld [vmem:[%s814_s25 + $0xd0] sm:$0xff] }
  0x25   : > { %654 = vmatpush3.bf16.msra.mxu0 %v653_v35  ;;  %v267_v59 = vld [vmem:[%s814_s25 + $0x140] sm:$0xff]  ;;  %v268_v61 = vld [vmem:[%s814_s25 + $0x148] sm:$0xff]  ;;  %v254_v63 = vld [vmem:[%s814_s25 + $0xd8] sm:$0xff]  ;;  %v661_v4 = vpack.c.bf16 %v236_v58, %v235_v57 }
  0x26   : > { %686 = vmatpush3.bf16.msra.mxu1 %v685_v39  ;;  %656 = vmatprep.subr.bf16.mxu0 %v655_v40  ;;  %v285_v2 = vld [vmem:[%s814_s25 + $0x1d0] sm:$0xff]  ;;  %v286_v3 = vld [vmem:[%s814_s25 + $0x1d8] sm:$0xff]  ;;  %v693_v5 = vpack.c.bf16 %v268_v61, %v267_v59  ;;  %v663_v6 = vpack.c.bf16 %v254_v63, %v253_v62  ;;  %v255_v12 = vld [vmem:[%s814_s25 + $0xe0] sm:$0xff] }
  0x27   : > { %688 = vmatprep.subr.bf16.mxu1 %v687_v44  ;;  %v237_v7 = vld [vmem:[%s814_s25 + $0x50] sm:$0xff]  ;;  %v238_v8 = vld [vmem:[%s814_s25 + $0x58] sm:$0xff]  ;;  %v695_v10 = vpack.c.bf16 %v286_v3, %v285_v2  ;;  %v256_v13 = vld [vmem:[%s814_s25 + $0xe8] sm:$0xff] }
  0x28   : > { %v269_v9 = vld [vmem:[%s814_s25 + $0x150] sm:$0xff]  ;;  %v270_v11 = vld [vmem:[%s814_s25 + $0x158] sm:$0xff]  ;;  %v287_v15 = vld [vmem:[%s814_s25 + $0x1e0] sm:$0xff]  ;;  %v665_v17 = vpack.c.bf16 %v238_v8, %v237_v7  ;;  %v667_v20 = vpack.c.bf16 %v256_v13, %v255_v12 }
  0x29   : > { %658 = vmatpush3.bf16.msra.mxu0 %v657_v54  ;;  %v288_v16 = vld [vmem:[%s814_s25 + $0x1e8] sm:$0xff]  ;;  %v239_v18 = vld [vmem:[%s814_s25 + $0x60] sm:$0xff]  ;;  %v697_v19 = vpack.c.bf16 %v270_v11, %v269_v9  ;;  %v257_v26 = vld [vmem:[%s814_s25 + $0xf0] sm:$0xff] }
  0x2a   : > { %690 = vmatpush3.bf16.msra.mxu1 %v689_v55  ;;  %660 = vmatprep.subr.bf16.mxu0 %v659_v56  ;;  %v240_v21 = vld [vmem:[%s814_s25 + $0x68] sm:$0xff]  ;;  %v271_v22 = vld [vmem:[%s814_s25 + $0x160] sm:$0xff]  ;;  %v699_v24 = vpack.c.bf16 %v288_v16, %v287_v15  ;;  %v258_v27 = vld [vmem:[%s814_s25 + $0xf8] sm:$0xff] }
  0x2b   : > { %692 = vmatprep.subr.bf16.mxu1 %v691_v60  ;;  %v226_v23 = vld [vmem:[%s809_s21] sm:$0xff]  ;;  %v272_v25 = vld [vmem:[%s814_s25 + $0x168] sm:$0xff]  ;;  %v289_v30 = vld [vmem:[%s814_s25 + $0x1f0] sm:$0xff]  ;;  %v669_v32 = vpack.c.bf16 %v240_v21, %v239_v18  ;;  %v671_v36 = vpack.c.bf16 %v258_v27, %v257_v26 }
  0x2c   : > { %v299_v28 = vrot.slane %v226_v23, %v298_v14  ;;  %v292_v29 = vcombine.high %v226_v23, %v226_v23  ;;  %v290_v31 = vld [vmem:[%s814_s25 + $0x1f8] sm:$0xff]  ;;  %v701_v35 = vpack.c.bf16 %v272_v25, %v271_v22  ;;  %v241_v37 = vld [vmem:[%s814_s25 + $0x70] sm:$0xff]  ;;  %v225_v51 = vld [vmem:[#allocation2] sm:$0x3] }
  0x2d   : > { %662 = vmatpush3.bf16.msra.mxu0 %v661_v4  ;;  %v242_v38 = vld [vmem:[%s814_s25 + $0x78] sm:$0xff]  ;;  %v703_v39 = vpack.c.bf16 %v290_v31, %v289_v30  ;;  %v273_v40 = vld [vmem:[%s814_s25 + $0x170] sm:$0xff]  ;;  %v569_v55 = vld [vmem:[%s904_s2] ss:$0 sm:$0xff] (!%p568_p7) }
  0x2e   : > { %694 = vmatpush3.bf16.msra.mxu1 %v693_v5  ;;  %664 = vmatprep.subr.bf16.mxu0 %v663_v6  ;;  %v307_v33 = vcombine.high %v299_v28, %v299_v28  ;;  %v306_v34 = vrot.slane %v292_v29, %v298_v14  ;;  %v274_v41 = vld [vmem:[%s814_s25 + $0x178] sm:$0xff]  ;;  %v673_v43 = vpack.c.bf16 %v242_v38, %v241_v37 }
  0x2f   : > { %696 = vmatprep.subr.bf16.mxu1 %v695_v10  ;;  %v705_v44 = vpack.c.bf16 %v274_v41, %v273_v40 }
  0x30   : > { %377 = vmatprep.mubr.f32.mxu0 %v307_v33  ;;  %v308_v42 = vcombine.high %v306_v34, %v306_v34 }
  0x31   : > { %666 = vmatpush3.bf16.msra.mxu0 %v665_v17 }
  0x32   : > { %698 = vmatpush3.bf16.msra.mxu1 %v697_v19  ;;  %668 = vmatprep.subr.bf16.mxu0 %v667_v20 }
  0x33   : > { %700 = vmatprep.subr.bf16.mxu1 %v699_v24  ;;  %447 = vmatprep.mubr.f32.mxu1 %v308_v42 }
  0x35   : > { %670 = vmatpush3.bf16.msra.mxu0 %v669_v32 }
  0x36   : > { %702 = vmatpush3.bf16.msra.mxu1 %v701_v35  ;;  %672 = vmatprep.subr.bf16.mxu0 %v671_v36 }
  0x37   : > { %704 = vmatprep.subr.bf16.mxu1 %v703_v39 }
  0x39   : > { %674 = vmatpush3.bf16.msra.mxu0 %v673_v43 }
  0x3a   : > { %706 = vmatpush3.bf16.msra.mxu1 %v705_v44 }
  0x3c   : > { %378 = vmatmul.mubr.f32.vlgmr.msra.gmra.mrb[0].mxu0 %v299_v28 }
  0x3d   : > { %448 = vmatmul.mubr.f32.vlgmr.msra.gmra.mrb[0].mxu1 %v306_v34 }
 0x10f   : > { %v605_v45 = vpop.f32.mrb[0].mxu0 }
 0x110   : > { %v640_v46 = vpop.f32.mrb[0].mxu1  ;;  %v606_v47 = vpop.f32.mrb[1].mxu0 }
 0x111   : > { %v607_v48 = vadd.f32 %v606_v47, %v605_v45  ;;  %v641_v49 = vpop.f32.mrb[1].mxu1 }
 0x112   : > { %v642_v50 = vadd.f32 %v641_v49, %v640_v46  ;;  %459 = sbr.rel (%p568_p7) target bundleno = 607 (0x25f), region = 40 }
 0x114   : > { %v450_v52 = vadd.f32 %v642_v50, %v607_v48 }
 0x116   : > { %v453_v53 = vadd.f32 %v450_v52, %v225_v51 }
 0x118   : > { %455 = vst.msk [vmem:[#allocation2] sm:$0x3] %vm454_vm1, %v453_v53 }
 0x11f   : > { %v460_v54 = vld [vmem:[#allocation2] sm:$0x3] }
 0x120   : > { %v461_v56 = vmul.f32 0.0009765625, %v460_v54 }
 0x122   : > { %v469_v57 = vadd.f32 %v569_v55, %v461_v56 }
 0x124   : > { %v470_v58 = vsel %vm454_vm1, %v469_v57, -inf }
 0x125   : > { %471 = vmax.xlane.f32.xlu0 %v470_v58 }
 0x1b2   : > { %v472_v59 = vpop.xlane.xlu0 %471 }
 0x1b3   : > { %v473_v60 = vsub.f32 %v469_v57, %v472_v59 }
 0x1b5   : > { %v474_v61 = vmul.f32 1.442695, %v473_v60 }
 0x1b7   : > { %734 = vpow2.f32 %v474_v61 }
 0x1c1   : > { %v735_v62 = vpop.eup %734 }
 0x1c2   : > { %v476_v63 = vsel %vm454_vm1, %v735_v62, 0.0 }
 0x1c3   : > { %477 = vadd.xlane.f32.xlu0 %v476_v63 }
 0x250   : > { %v478_v0 = vpop.xlane.xlu0 %477 }
 0x251   : > { %736 = vrcp.f32 %v478_v0 }
 0x25b   : > { %v737_v1 = vpop.eup %736 }
 0x25c   : > { %v480_v2 = vmul.f32 %v737_v1, %v735_v62 }
 0x25e   : > { %481 = vst.msk [vmem:[%s905_s3] sm:$0x3] %vm454_vm1, %v480_v2 }
 0x25f PF: > { %s13_s14 = sadd.s32 1, %s760_s14   ;;  %s906_s12 = smov %s756_s13 }
 0x260   : > { %p10_p8 = scmp.ge.s32.totalorder %s13_s14, 4   ;;  %s907_s13 = smov %s909_s15 }
 0x262   :  { %12 = sbr.rel (!%p10_p8) target bundleno = 2 (0x2), region = 73 }

// kernel: cond_conv2d_forward.3
= control target key start
LH: loop header
LB: loop body
LE: loop exit
PB: predicated region body
PF: predicated region fallthrough
CT: control target
= control target key end

     0   :  { %10 = vsyncpa [#allocation3], 0  ;;  %s1789_s18 = smov 0   ;;  %s2138_s0 = inlined_call_operand.vmem [shape: f32[2,4], index: 0, kind: input, shape index: {}]   ;;  %s2139_s1 = inlined_call_operand.vmem [shape: f32[2,4,423], index: 1, kind: input, shape index: {}]   ;;  %s2140_s2 = inlined_call_operand.vmem [shape: f32[4,9,8,4], index: 2, kind: input, shape index: {}]   ;;  %s2141_s3 = inlined_call_operand.vmem [shape: f32[9,8,4], index: 3, kind: input, shape index: {}]   ;;  %s2142_s4 = inlined_call_operand.vmem [shape: f32[8,1], index: 4, kind: input, shape index: {}]   ;;  %s2143_s5 = inlined_call_operand.vmem [shape: f32[2,8,384], index: 5, kind: output, shape index: {}]  }
   0x1 LB: > { %s1795_s19 = sadd.s32 4294967295, %s1745_s18   ;;  %p1548_p0 = scmp.ge.s32.totalorder %s1745_s18, 1  ;;  %s1745_s18 = sphi %s1789_s18, %s16_s18  }
   0x2   : > { %p157_p1 = scmp.lt.s32.totalorder %s1745_s18, 3  ;;  %s170_s22 = sshll.u32 %s2138_s0, 4  ;;  %s171_s22 = int_to_ptr.vmem [resolvable:$true] %s170_s22 }
   0x3   : > { %p1695_p3 = scmp.eq.s32.totalorder %s1795_s19, 0  ;;  %s1720_s24 = scalar_lea.vmem %s171_s22, 32 }
   0x4   : > { %p1802_p2 = pnand %p1548_p0, %p157_p1  ;;  %p1721_p6 = scmp.ne.s32.totalorder %s171_s22, %s1720_s24 }
   0x5   : > { %p1728_p10 = scmp.lt.s32.totalorder %s171_s22, %s171_s22  ;;  %p1729_p11 = scmp.lt.s32.totalorder %s1720_s24, %s1720_s24 }
   0x6   : > { %p1691_p4 = pneg %p1802_p2 }
   0x7   : > { %p1730_p12 = por %p1729_p11, %p1728_p10 }
   0x8   : > { %p1692_p5 = pnand %p1695_p3, %p1691_p4 }
   0xa   : > { %p1722_p7 = pneg %p1692_p5 }
   0xc   : > { %p1723_p8 = pnand %p1722_p7, %p1721_p6 }
   0xe   : > { %p1724_p9 = pneg %p1723_p8 }
  0x10   : > { %p1731_p13 = pnand %p1730_p12, %p1724_p9 }
  0x12   : > { %1734 = shalt.err (!%p1731_p13)
}
  0x13   : > { %s1747_s25 = smov [#allocation2]   ;;  %200 = sbr.rel (%p1802_p2) target bundleno = 444 (0x1bc), region = 40 }
  0x14   : > { %1694 = dma.vmem_to_smem (!%p1692_p5), %s171_s22, 32, %s1747_s25, [#allocation3]  }
  0x1a   : > { %1740 = dma.done.wait (%p1695_p3), [#allocation3], 32  }
  0x1b   : > { %1742 = vsyncadd (%p1695_p3), [#allocation3], 4294967264 }
  0x1c   : > { %206 = sfence }
  0x1d   : > { %p229_p0 = scmp.lt.s32.totalorder %s1795_s19, 1  ;;  %v1748_v0 = vmov 0.0   ;;  %v1749_v1 = vmov 0   ;;  %vm1750_vm0 = vmmov 0   ;;  %s1751_s6 = smov 127   ;;  %v259_v11 = vld [vmem:[%s2140_s2 + $0x40] sm:$0xff] }
  0x1e   : > { %1632 = vmatprep.subr.bf16.mxu1 %v1748_v0  ;;  %457 = vmatprep.mubr.bf16.mxu0 %v1749_v1  ;;  %s1752_s7 = smov 126   ;;  %s1753_s8 = smov 110   ;;  %v248_v14 = vld [vmem:[%s2141_s3 + $0x40] sm:$0xff]  ;;  %v1565_v15 = vld [vmem:[%s2140_s2 + $0x88] sm:$0xff]  ;;  %v1574_v19 = vld [vmem:[%s2140_s2 + $0xd0] sm:$0xff]  ;;  %vm407_vm1 = vcmask 1039360  }
  0x1f   : > { %s1820_s26 = scalar_select %p229_p0, %s1795_s19, 1  ;;  %1634 = vmatprep.mubr.msk.bf16.mxu1 %vm1750_vm0, %v1748_v0  ;;  %1717 = vset.pattern.permute.xlu0 %v1749_v1  ;;  %v1583_v23 = vld [vmem:[%s2140_s2 + $0x118] sm:$0xff]  ;;  %v1467_v27 = vld [vmem:[%s2142_s4] sm:$0xff]  ;;  %v252_v28 = vld [vmem:[%s2140_s2 + $0x8] sm:$0xff]  ;;  %vm415_vm2 = vcmask 1041408   ;;  %vm411_vm3 = vcmask 31744  }
  0x20   : > { %s1754_s9 = smov 109   ;;  %s1755_s10 = smov 108   ;;  %v241_v30 = vld [vmem:[%s2141_s3 + $0x8] sm:$0xff]  ;;  %v1558_v31 = vld [vmem:[%s2140_s2 + $0x50] sm:$0xff]  ;;  %v1567_v34 = vld [vmem:[%s2140_s2 + $0x98] sm:$0xff]  ;;  %vm623_vm4 = vcmask 1031168  }
  0x21   : > { %s1613_s27 = sshll.u32 %s1820_s26, 4  ;;  %s1556_s11 = sshll.u32 %s1795_s19, 7  ;;  %v251_v35 = vld [vmem:[%s2140_s2] sm:$0xff]  ;;  %v1557_v41 = vld [vmem:[%s2140_s2 + $0x48] sm:$0xff]  ;;  %v253_v42 = vld [vmem:[%s2140_s2 + $0x10] sm:$0xff]  ;;  %vm747_vm5 = vcmask 900096  }
  0x22   : > { %s1830_s30 = scalar_lea.vmem %s2139_s1, %s1613_s27  ;;  %s279_s12 = sadd.s32 1, %s1556_s11  ;;  %v1576_v39 = vld [vmem:[%s2140_s2 + $0xe0] sm:$0xff]  ;;  %v1566_v47 = vld [vmem:[%s2140_s2 + $0x90] sm:$0xff]  ;;  %v1575_v52 = vld [vmem:[%s2140_s2 + $0xd8] sm:$0xff]  ;;  %vm871_vm6 = vcmask 891904   ;;  %vm995_vm7 = vcmask 883712  }
  0x23   : > { %v389_v2 = vld [vmem:[%s1830_s30 + $0x8] sm:$0xff]  ;;  %v381_v3 = vld [vmem:[%s1830_s30] sm:$0xff]  ;;  %s250_s13 = sld [smem:[#allocation2 + %s1556_s11]]  ;;  %s1756_s14 = smov 92   ;;  %v242_v53 = vld [vmem:[%s2141_s3 + $0x10] sm:$0xff]  ;;  %vm1119_vm8 = vcmask 752640  }
  0x24   : > { %v1834_v4 = vpack.c.bf16 %v389_v2, %v389_v2  ;;  %v391_v5 = vcombine.high %v389_v2, %v389_v2  ;;  %v1836_v6 = vpack.c.bf16 %v381_v3, %v381_v3  ;;  %v384_v7 = vcombine.high %v381_v3, %v381_v3  ;;  %s310_s15 = sadd.s32 2, %s1556_s11  ;;  %s280_s16 = sld [smem:[#allocation2 + %s279_s12]]  ;;  %v240_v40 = vld [vmem:[%s2141_s3] sm:$0xff]  ;;  %v382_v51 = vld [vmem:[%s1830_s30 + $0x8] sm:$0xf]  ;;  %v1559_v57 = vld [vmem:[%s2140_s2 + $0x58] sm:$0xff] }
  0x25   : > { %s341_s17 = sadd.s32 3, %s1556_s11  ;;  %s311_s20 = sld [smem:[#allocation2 + %s310_s15]]  ;;  %v388_v60 = vpack.c.bf16 %v382_v51, %v382_v51  ;;  %vm1243_vm9 = vcmask 744448   ;;  %vm1367_vm10 = vcmask 736256  }
  0x26   : > { %403 = vrot.lane.b32.xlu1 %v1834_v4, %s1751_s6  ;;  %399 = vrot.lane.b32.xlu0 %v1836_v6, %s1751_s6  ;;  %v394_v8 = vpack.c.bf16 %v391_v5, %v391_v5  ;;  %v1840_v9 = vpack.c.bf16 %v384_v7, %v384_v7  ;;  %s342_s21 = sld [smem:[#allocation2 + %s341_s17]]  ;;  %s1757_s23 = smov 91  }
  0x27   : > { %s1686_s24 = smul.u32 24, %s1820_s26 }
  0x29   : > { %v1859_v10 = vstv %s250_s13  ;;  %s238_s28 = scalar_lea.vmem %s2143_s5, %s1686_s24 }
  0x2a   : > { %405 = vrot.lane.b32.xlu1 %v394_v8, %s1751_s6  ;;  %401 = vrot.lane.b32.xlu0 %v1840_v9, %s1751_s6  ;;  %v269_v12 = vmul.f32 %v1859_v10, %v259_v11  ;;  %v1867_v13 = vstv %s280_s16  ;;  %v262_v29 = vmul.f32 %v1859_v10, %v252_v28  ;;  %v261_v38 = vmul.f32 %v1859_v10, %v251_v35 }
  0x2b   : > { %v300_v17 = vmul.f32 %v1565_v15, %v1867_v13  ;;  %v1876_v18 = vstv %s311_s20  ;;  %v293_v33 = vmul.f32 %v1558_v31, %v1867_v13  ;;  %v292_v46 = vmul.f32 %v1557_v41, %v1867_v13 }
  0x2c   : > { %v278_v16 = vadd.f32 %v269_v12, %v248_v14  ;;  %v331_v21 = vmul.f32 %v1574_v19, %v1876_v18  ;;  %v1883_v22 = vstv %s342_s21  ;;  %v271_v32 = vadd.f32 %v262_v29, %v241_v30  ;;  %v1568_v12 = vld [vmem:[%s2140_s2 + $0xa0] sm:$0xff]  ;;  %v254_v14 = vld [vmem:[%s2140_s2 + $0x18] sm:$0xff] }
  0x2d   : > { %v362_v25 = vmul.f32 %v1583_v23, %v1883_v22  ;;  %v324_v37 = vmul.f32 %v1567_v34, %v1876_v18  ;;  %v355_v44 = vmul.f32 %v1576_v39, %v1883_v22  ;;  %v270_v45 = vadd.f32 %v261_v38, %v240_v40  ;;  %v255_v38 = vld [vmem:[%s2140_s2 + $0x20] sm:$0xff] }
  0x2e   : > { %615 = vrot.lane.b32.xlu0 %v1836_v6, %s1752_s7  ;;  %617 = vrot.lane.b32.xlu1 %v1840_v9, %s1752_s7  ;;  %v309_v20 = vadd.f32 %v300_v17, %v278_v16  ;;  %v302_v36 = vadd.f32 %v293_v33, %v271_v32  ;;  %v263_v50 = vmul.f32 %v1859_v10, %v253_v42  ;;  %v510_v16 = vsel %vm415_vm2, %v1836_v6, 0 }
  0x2f   : > { %v301_v55 = vadd.f32 %v292_v46, %v270_v45  ;;  %v323_v56 = vmul.f32 %v1566_v47, %v1876_v18  ;;  %v354_v61 = vmul.f32 %v1575_v52, %v1883_v22  ;;  %v516_v19 = vsel %vm415_vm2, %v388_v60, 0  ;;  %v1578_v46 = vld [vmem:[%s2140_s2 + $0xf0] sm:$0xff] }
  0x30   : > { %v340_v24 = vadd.f32 %v331_v21, %v309_v20  ;;  %v333_v43 = vadd.f32 %v324_v37, %v302_v36  ;;  %v272_v62 = vadd.f32 %v263_v50, %v242_v53  ;;  %v325_v20 = vmul.f32 %v1568_v12, %v1876_v18  ;;  %v1569_v37 = vld [vmem:[%s2140_s2 + $0xa8] sm:$0xff] }
  0x31   : > { %v332_v11 = vadd.f32 %v323_v56, %v301_v55  ;;  %v265_v47 = vmul.f32 %v1859_v10, %v255_v38  ;;  %v357_v55 = vmul.f32 %v1578_v46, %v1883_v22  ;;  %v256_v56 = vld [vmem:[%s2140_s2 + $0x28] sm:$0xff]  ;;  %v1563_v38 = vld [vmem:[%s2140_s2 + $0x78] sm:$0xff] }
  0x32   : > { %619 = vrot.lane.b32.xlu0 %v1834_v4, %s1752_s7  ;;  %621 = vrot.lane.b32.xlu1 %v394_v8, %s1752_s7  ;;  %v1891_v26 = vadd.f32 %v362_v25, %v340_v24  ;;  %v364_v54 = vadd.f32 %v355_v44, %v333_v43  ;;  %v243_v24 = vld [vmem:[%s2141_s3 + $0x18] sm:$0xff]  ;;  %v1560_v25 = vld [vmem:[%s2140_s2 + $0x60] sm:$0xff]  ;;  %v326_v43 = vmul.f32 %v1569_v37, %v1876_v18 }
  0x33   : > { %v363_v21 = vadd.f32 %v354_v61, %v332_v11  ;;  %v295_v36 = vmul.f32 %v1560_v25, %v1867_v13  ;;  %v1570_v61 = vld [vmem:[%s2140_s2 + $0xb0] sm:$0xff] }
  0x34   : > { %v327_v12 = vmul.f32 %v1570_v61, %v1876_v18  ;;  %v246_v37 = vld [vmem:[%s2141_s3 + $0x30] sm:$0xff]  ;;  %v1564_v61 = vld [vmem:[%s2140_s2 + $0x80] sm:$0xff] }
  0x35   : > { %v372_v33 = vpack.c.bf16 %v363_v21, %v363_v21 }
  0x36   : > { %739 = vrot.lane.b32.xlu0 %v1836_v6, %s1753_s8  ;;  %741 = vrot.lane.b32.xlu1 %v1840_v9, %s1753_s8 }
  0x3a   : > { %743 = vrot.lane.b32.xlu0 %v1834_v4, %s1753_s8  ;;  %745 = vrot.lane.b32.xlu1 %v394_v8, %s1753_s8 }
  0x3e   : > { %863 = vrot.lane.b32.xlu0 %v1836_v6, %s1754_s9  ;;  %865 = vrot.lane.b32.xlu1 %v1840_v9, %s1754_s9 }
  0x42   : > { %867 = vrot.lane.b32.xlu0 %v1834_v4, %s1754_s9  ;;  %869 = vrot.lane.b32.xlu1 %v394_v8, %s1754_s9  ;;  %s1758_s9 = smov 90  }
  0x46   : > { %987 = vrot.lane.b32.xlu0 %v1836_v6, %s1755_s10  ;;  %989 = vrot.lane.b32.xlu1 %v1840_v9, %s1755_s10 }
  0x4a   : > { %991 = vrot.lane.b32.xlu0 %v1834_v4, %s1755_s10  ;;  %993 = vrot.lane.b32.xlu1 %v394_v8, %s1755_s10 }
  0x4e   : > { %1111 = vrot.lane.b32.xlu0 %v1836_v6, %s1756_s14  ;;  %1113 = vrot.lane.b32.xlu1 %v1840_v9, %s1756_s14 }
  0x52   : > { %1115 = vrot.lane.b32.xlu0 %v1834_v4, %s1756_s14  ;;  %1117 = vrot.lane.b32.xlu1 %v394_v8, %s1756_s14 }
  0x56   : > { %1235 = vrot.lane.b32.xlu0 %v1836_v6, %s1757_s23  ;;  %1237 = vrot.lane.b32.xlu1 %v1840_v9, %s1757_s23 }
  0x5a   : > { %1239 = vrot.lane.b32.xlu0 %v1834_v4, %s1757_s23  ;;  %1241 = vrot.lane.b32.xlu1 %v394_v8, %s1757_s23 }
  0x5e   : > { %1359 = vrot.lane.b32.xlu0 %v1836_v6, %s1758_s9  ;;  %1361 = vrot.lane.b32.xlu1 %v1840_v9, %s1758_s9  ;;  %v264_v6 = vmul.f32 %v1859_v10, %v254_v14  ;;  %v1579_v14 = vld [vmem:[%s2140_s2 + $0xf8] sm:$0xff] }
  0x5f   : > { %v358_v25 = vmul.f32 %v1579_v14, %v1883_v22 }
  0x60   : > { %v273_v35 = vadd.f32 %v264_v6, %v243_v24 }
  0x62   : > { %1363 = vrot.lane.b32.xlu0 %v1834_v4, %s1758_s9  ;;  %1365 = vrot.lane.b32.xlu1 %v394_v8, %s1758_s9  ;;  %v294_v4 = vmul.f32 %v1559_v57, %v1867_v13  ;;  %v373_v8 = vpack.c.bf16 %v364_v54, %v364_v54  ;;  %v304_v45 = vadd.f32 %v295_v36, %v273_v35  ;;  %v1580_v35 = vld [vmem:[%s2140_s2 + $0x100] sm:$0xff] }
  0x64   : > { %v303_v23 = vadd.f32 %v294_v4, %v272_v62  ;;  %v266_v4 = vmul.f32 %v1859_v10, %v256_v56 }
  0x66   : > { %1470 = vperm.xlu0 %1717, %v1467_v27   ;;  %v334_v34 = vadd.f32 %v325_v20, %v303_v23 }
  0x98   : > { %v404_v48 = vpop.permute.xlu1 %403  ;;  %v400_v49 = vpop.permute.xlu0 %399 }
  0x9c   : > { %v406_v58 = vpop.permute.xlu1 %405  ;;  %v402_v59 = vpop.permute.xlu0 %401 }
  0x9d   : > { %v409_v63 = vsel %vm407_vm1, %v402_v59, %v404_v48  ;;  %v408_v2 = vsel %vm407_vm1, %v400_v49, %v402_v59  ;;  %v410_v3 = vsel %vm407_vm1, %v404_v48, %v406_v58  ;;  %v244_v48 = vld [vmem:[%s2141_s3 + $0x20] sm:$0xff]  ;;  %v1561_v49 = vld [vmem:[%s2140_s2 + $0x68] sm:$0xff]  ;;  %v335_v58 = vadd.f32 %v326_v43, %v304_v45 }
  0x9e   : > { %1584 = vmatprep.subr.msk.bf16.mxu0 %vm415_vm2, %v409_v63  ;;  %v417_v5 = vsel %vm415_vm2, %v408_v2, 0  ;;  %v423_v7 = vsel %vm415_vm2, %v410_v3, 0  ;;  %v274_v59 = vadd.f32 %v265_v47, %v244_v48  ;;  %v296_v60 = vmul.f32 %v1561_v49, %v1867_v13  ;;  %v1572_v49 = vld [vmem:[%s2140_s2 + $0xc0] sm:$0xff] }
  0x9f   : > { %426 = vmatpush1.bf16.msra.mxu0 %v417_v5  ;;  %1633 = vmatpush3.bf16.msra.mxu1 %v423_v7  ;;  %v245_v5 = vld [vmem:[%s2141_s3 + $0x28] sm:$0xff]  ;;  %v1562_v7 = vld [vmem:[%s2140_s2 + $0x70] sm:$0xff]  ;;  %v359_v45 = vmul.f32 %v1580_v35, %v1883_v22  ;;  %v298_v48 = vmul.f32 %v1563_v38, %v1867_v13 }
  0xa0   : > { %v616_v15 = vpop.permute.xlu0 %615  ;;  %1587 = vmatprep.subr.msk.bf16.mxu0 %vm415_vm2, %v1840_v9  ;;  %1638 = vmatprep.subr.bf16.mxu1 %v1748_v0  ;;  %v618_v17 = vpop.permute.xlu1 %617  ;;  %v1577_v9 = vld [vmem:[%s2140_s2 + $0xe8] sm:$0xff]  ;;  %v305_v11 = vadd.f32 %v296_v60, %v274_v59  ;;  %v247_v60 = vld [vmem:[%s2141_s3 + $0x38] sm:$0xff] }
  0xa1   : > { %v624_v29 = vsel %vm623_vm4, %v616_v15, %v618_v17  ;;  %v356_v32 = vmul.f32 %v1577_v9, %v1883_v22  ;;  %v1571_v9 = vld [vmem:[%s2140_s2 + $0xb8] sm:$0xff]  ;;  %v1581_v59 = vld [vmem:[%s2140_s2 + $0x108] sm:$0xff] }
  0xa2   : > { %1585 = vmatmul.mubr.msk.bf16.vlgmr.msra.gmra.mrb[0].mxu0 %vm411_vm3, %v373_v8  ;;  %1635 = vmatmul.mubr.msk.bf16.vlgmr.msra.gmra.mrb[0].mxu1 %vm411_vm3, %v373_v8  ;;  %v631_v39 = vsel %vm415_vm2, %v624_v29, 0  ;;  %v366_v8 = vadd.f32 %v357_v55, %v335_v58  ;;  %v336_v24 = vadd.f32 %v327_v12, %v305_v11  ;;  %v299_v11 = vmul.f32 %v1564_v61, %v1867_v13  ;;  %v1573_v12 = vld [vmem:[%s2140_s2 + $0xc8] sm:$0xff] }
  0xa3   : > { %519 = vmatpush1.bf16.msra.mxu0 %v510_v16  ;;  %1639 = vmatpush3.bf16.msra.mxu1 %v516_v19  ;;  %v365_v44 = vadd.f32 %v356_v32, %v334_v34  ;;  %v297_v19 = vmul.f32 %v1562_v7, %v1867_v13  ;;  %v360_v7 = vmul.f32 %v1581_v59, %v1883_v22  ;;  %v1582_v13 = vld [vmem:[%s2140_s2 + $0x110] sm:$0xff] }
  0xa4   : > { %v620_v27 = vpop.permute.xlu0 %619  ;;  %v622_v28 = vpop.permute.xlu1 %621  ;;  %550 = vmatprep.mubr.bf16.mxu0 %v1749_v1  ;;  %1640 = vmatprep.mubr.msk.bf16.mxu1 %vm1750_vm0, %v1748_v0  ;;  %v375_v6 = vpack.c.bf16 %v366_v8, %v366_v8  ;;  %v367_v34 = vadd.f32 %v358_v25, %v336_v24 }
  0xa5   : > { %v625_v30 = vsel %vm623_vm4, %v618_v17, %v620_v27  ;;  %v626_v31 = vsel %vm623_vm4, %v620_v27, %v622_v28  ;;  %1644 = vmatprep.subr.bf16.mxu1 %v1748_v0  ;;  %v374_v57 = vpack.c.bf16 %v365_v44, %v365_v44  ;;  %v275_v17 = vadd.f32 %v266_v4, %v245_v5  ;;  %v257_v27 = vld [vmem:[%s2140_s2 + $0x30] sm:$0xff] }
  0xa6   : > { %1590 = vmatprep.subr.msk.bf16.mxu0 %vm415_vm2, %v625_v30  ;;  %v637_v40 = vsel %vm415_vm2, %v626_v31, 0  ;;  %v267_v36 = vmul.f32 %v1859_v10, %v257_v27  ;;  %v376_v46 = vpack.c.bf16 %v367_v34, %v367_v34 }
  0xa7   : > { %v306_v32 = vadd.f32 %v297_v19, %v275_v17 }
  0xa8   : > { %v740_v41 = vpop.permute.xlu0 %739  ;;  %v742_v42 = vpop.permute.xlu1 %741  ;;  %v276_v47 = vadd.f32 %v267_v36, %v246_v37 }
  0xa9   : > { %v748_v52 = vsel %vm747_vm5, %v740_v41, %v742_v42 }
  0xaa   : > { %1588 = vmatmul.mubr.msk.bf16.vlgmr.msra.gmra.mrb[4].mxu0 %vm411_vm3, %v372_v33  ;;  %1641 = vmatmul.mubr.msk.bf16.vlgmr.msra.gmra.mrb[4].mxu1 %vm411_vm3, %v372_v33  ;;  %v755_v62 = vsel %vm415_vm2, %v748_v52, 0  ;;  %v328_v33 = vmul.f32 %v1571_v9, %v1876_v18  ;;  %v307_v56 = vadd.f32 %v298_v48, %v276_v47 }
  0xab   : > { %640 = vmatpush1.bf16.msra.mxu0 %v631_v39  ;;  %1645 = vmatpush3.bf16.msra.mxu1 %v637_v40 }
  0xac   : > { %v744_v50 = vpop.permute.xlu0 %743  ;;  %v746_v51 = vpop.permute.xlu1 %745  ;;  %671 = vmatprep.mubr.bf16.mxu0 %v1749_v1  ;;  %1646 = vmatprep.mubr.msk.bf16.mxu1 %vm1750_vm0, %v1748_v0  ;;  %v337_v41 = vadd.f32 %v328_v33, %v306_v32 }
  0xad   : > { %v749_v53 = vsel %vm747_vm5, %v742_v42, %v744_v50  ;;  %v750_v54 = vsel %vm747_vm5, %v744_v50, %v746_v51  ;;  %1650 = vmatprep.subr.bf16.mxu1 %v1748_v0  ;;  %v258_v50 = vld [vmem:[%s2140_s2 + $0x38] sm:$0xff] }
  0xae   : > { %1593 = vmatprep.subr.msk.bf16.mxu0 %vm415_vm2, %v749_v53  ;;  %v761_v63 = vsel %vm415_vm2, %v750_v54, 0  ;;  %v368_v55 = vadd.f32 %v359_v45, %v337_v41  ;;  %v268_v58 = vmul.f32 %v1859_v10, %v258_v50  ;;  %v380_v41 = vpack.c.bf16 %v1891_v26, %v1891_v26 }
  0xb0   : > { %v864_v2 = vpop.permute.xlu0 %863  ;;  %v866_v3 = vpop.permute.xlu1 %865  ;;  %v377_v4 = vpack.c.bf16 %v368_v55, %v368_v55  ;;  %v277_v8 = vadd.f32 %v268_v58, %v247_v60 }
  0xb1   : > { %v872_v20 = vsel %vm871_vm6, %v864_v2, %v866_v3 }
  0xb2   : > { %1591 = vmatmul.mubr.msk.bf16.vlgmr.msra.gmra.mrb[8].mxu0 %vm411_vm3, %v374_v57  ;;  %1647 = vmatmul.mubr.msk.bf16.vlgmr.msra.gmra.mrb[8].mxu1 %vm411_vm3, %v374_v57  ;;  %v879_v28 = vsel %vm415_vm2, %v872_v20, 0  ;;  %v329_v57 = vmul.f32 %v1572_v49, %v1876_v18  ;;  %v308_v20 = vadd.f32 %v299_v11, %v277_v8 }
  0xb3   : > { %764 = vmatpush1.bf16.msra.mxu0 %v755_v62  ;;  %1651 = vmatpush3.bf16.msra.mxu1 %v761_v63 }
  0xb4   : > { %v868_v15 = vpop.permute.xlu0 %867  ;;  %v870_v16 = vpop.permute.xlu1 %869  ;;  %795 = vmatprep.mubr.bf16.mxu0 %v1749_v1  ;;  %1652 = vmatprep.mubr.msk.bf16.mxu1 %vm1750_vm0, %v1748_v0  ;;  %v338_v5 = vadd.f32 %v329_v57, %v307_v56 }
  0xb5   : > { %v873_v21 = vsel %vm871_vm6, %v866_v3, %v868_v15  ;;  %v874_v23 = vsel %vm871_vm6, %v868_v15, %v870_v16  ;;  %1656 = vmatprep.subr.bf16.mxu1 %v1748_v0 }
  0xb6   : > { %1596 = vmatprep.subr.msk.bf16.mxu0 %vm415_vm2, %v873_v21  ;;  %v885_v29 = vsel %vm415_vm2, %v874_v23, 0  ;;  %v369_v19 = vadd.f32 %v360_v7, %v338_v5  ;;  %v330_v21 = vmul.f32 %v1573_v12, %v1876_v18 }
  0xb8   : > { %v988_v30 = vpop.permute.xlu0 %987  ;;  %v990_v31 = vpop.permute.xlu1 %989  ;;  %v378_v18 = vpack.c.bf16 %v369_v19, %v369_v19  ;;  %v339_v27 = vadd.f32 %v330_v21, %v308_v20 }
  0xb9   : > { %v996_v42 = vsel %vm995_vm7, %v988_v30, %v990_v31 }
  0xba   : > { %1594 = vmatmul.mubr.msk.bf16.vlgmr.msra.gmra.mrb[12].mxu0 %vm411_vm3, %v375_v6  ;;  %1653 = vmatmul.mubr.msk.bf16.vlgmr.msra.gmra.mrb[12].mxu1 %vm411_vm3, %v375_v6  ;;  %v1003_v51 = vsel %vm415_vm2, %v996_v42, 0 }
  0xbb   : > { %888 = vmatpush1.bf16.msra.mxu0 %v879_v28  ;;  %1657 = vmatpush3.bf16.msra.mxu1 %v885_v29  ;;  %v361_v28 = vmul.f32 %v1582_v13, %v1883_v22 }
  0xbc   : > { %v992_v39 = vpop.permute.xlu0 %991  ;;  %v994_v40 = vpop.permute.xlu1 %993  ;;  %919 = vmatprep.mubr.bf16.mxu0 %v1749_v1  ;;  %1658 = vmatprep.mubr.msk.bf16.mxu1 %vm1750_vm0, %v1748_v0 }
  0xbd   : > { %v997_v43 = vsel %vm995_vm7, %v990_v31, %v992_v39  ;;  %v998_v44 = vsel %vm995_vm7, %v992_v39, %v994_v40  ;;  %1662 = vmatprep.subr.bf16.mxu1 %v1748_v0  ;;  %v370_v33 = vadd.f32 %v361_v28, %v339_v27 }
  0xbe   : > { %1599 = vmatprep.subr.msk.bf16.mxu0 %vm415_vm2, %v997_v43  ;;  %v1009_v52 = vsel %vm415_vm2, %v998_v44, 0 }
  0xbf   : > { %v379_v38 = vpack.c.bf16 %v370_v33, %v370_v33 }
  0xc0   : > { %v1112_v53 = vpop.permute.xlu0 %1111  ;;  %v1114_v54 = vpop.permute.xlu1 %1113 }
  0xc1   : > { %v1120_v10 = vsel %vm1119_vm8, %v1112_v53, %v1114_v54 }
  0xc2   : > { %1597 = vmatmul.mubr.msk.bf16.vlgmr.msra.gmra.mrb[16].mxu0 %vm411_vm3, %v376_v46  ;;  %1659 = vmatmul.mubr.msk.bf16.vlgmr.msra.gmra.mrb[16].mxu1 %vm411_vm3, %v376_v46  ;;  %v1127_v14 = vsel %vm415_vm2, %v1120_v10, 0 }
  0xc3   : > { %1012 = vmatpush1.bf16.msra.mxu0 %v1003_v51  ;;  %1663 = vmatpush3.bf16.msra.mxu1 %v1009_v52 }
  0xc4   : > { %v1116_v62 = vpop.permute.xlu0 %1115  ;;  %v1118_v63 = vpop.permute.xlu1 %1117  ;;  %1043 = vmatprep.mubr.bf16.mxu0 %v1749_v1  ;;  %1664 = vmatprep.mubr.msk.bf16.mxu1 %vm1750_vm0, %v1748_v0 }
  0xc5   : > { %v1121_v2 = vsel %vm1119_vm8, %v1114_v54, %v1116_v62  ;;  %v1122_v3 = vsel %vm1119_vm8, %v1116_v62, %v1118_v63  ;;  %1668 = vmatprep.subr.bf16.mxu1 %v1748_v0 }
  0xc6   : > { %1602 = vmatprep.subr.msk.bf16.mxu0 %vm415_vm2, %v1121_v2  ;;  %v1133_v15 = vsel %vm415_vm2, %v1122_v3, 0 }
  0xc8   : > { %v1236_v16 = vpop.permute.xlu0 %1235  ;;  %v1238_v17 = vpop.permute.xlu1 %1237 }
  0xc9   : > { %v1244_v6 = vsel %vm1243_vm9, %v1236_v16, %v1238_v17 }
  0xca   : > { %1600 = vmatmul.mubr.msk.bf16.vlgmr.msra.gmra.mrb[20].mxu0 %vm411_vm3, %v377_v4  ;;  %1665 = vmatmul.mubr.msk.bf16.vlgmr.msra.gmra.mrb[20].mxu1 %vm411_vm3, %v377_v4  ;;  %v1251_v29 = vsel %vm415_vm2, %v1244_v6, 0 }
  0xcb   : > { %1136 = vmatpush1.bf16.msra.mxu0 %v1127_v14  ;;  %1669 = vmatpush3.bf16.msra.mxu1 %v1133_v15 }
  0xcc   : > { %v1240_v23 = vpop.permute.xlu0 %1239  ;;  %v1242_v9 = vpop.permute.xlu1 %1241  ;;  %1167 = vmatprep.mubr.bf16.mxu0 %v1749_v1  ;;  %1670 = vmatprep.mubr.msk.bf16.mxu1 %vm1750_vm0, %v1748_v0 }
  0xcd   : > { %v1245_v24 = vsel %vm1243_vm9, %v1238_v17, %v1240_v23  ;;  %v1246_v25 = vsel %vm1243_vm9, %v1240_v23, %v1242_v9  ;;  %1674 = vmatprep.subr.bf16.mxu1 %v1748_v0 }
  0xce   : > { %1605 = vmatprep.subr.msk.bf16.mxu0 %vm415_vm2, %v1245_v24  ;;  %v1257_v30 = vsel %vm415_vm2, %v1246_v25, 0 }
  0xd0   : > { %v1360_v31 = vpop.permute.xlu0 %1359  ;;  %v1362_v32 = vpop.permute.xlu1 %1361 }
  0xd1   : > { %v1368_v22 = vsel %vm1367_vm10, %v1360_v31, %v1362_v32 }
  0xd2   : > { %1603 = vmatmul.mubr.msk.bf16.vlgmr.msra.gmra.mrb[24].mxu0 %vm411_vm3, %v378_v18  ;;  %1671 = vmatmul.mubr.msk.bf16.vlgmr.msra.gmra.mrb[24].mxu1 %vm411_vm3, %v378_v18  ;;  %v1375_v39 = vsel %vm415_vm2, %v1368_v22, 0 }
  0xd3   : > { %1260 = vmatpush1.bf16.msra.mxu0 %v1251_v29  ;;  %1675 = vmatpush3.bf16.msra.mxu1 %v1257_v30 }
  0xd4   : > { %v1364_v34 = vpop.permute.xlu0 %1363  ;;  %v1366_v35 = vpop.permute.xlu1 %1365  ;;  %1291 = vmatprep.mubr.bf16.mxu0 %v1749_v1  ;;  %1676 = vmatprep.mubr.msk.bf16.mxu1 %vm1750_vm0, %v1748_v0 }
  0xd5   : > { %v1369_v36 = vsel %vm1367_vm10, %v1362_v32, %v1364_v34  ;;  %v1370_v37 = vsel %vm1367_vm10, %v1364_v34, %v1366_v35  ;;  %1680 = vmatprep.subr.bf16.mxu1 %v1748_v0 }
  0xd6   : > { %1608 = vmatprep.subr.msk.bf16.mxu0 %vm415_vm2, %v1369_v36  ;;  %v1381_v40 = vsel %vm415_vm2, %v1370_v37, 0 }
  0xda   : > { %1606 = vmatmul.mubr.msk.bf16.vlgmr.msra.gmra.mrb[28].mxu0 %vm411_vm3, %v379_v38  ;;  %1677 = vmatmul.mubr.msk.bf16.vlgmr.msra.gmra.mrb[28].mxu1 %vm411_vm3, %v379_v38 }
  0xdb   : > { %1384 = vmatpush1.bf16.msra.mxu0 %v1375_v39  ;;  %1681 = vmatpush3.bf16.msra.mxu1 %v1381_v40 }
  0xdc   : > { %1415 = vmatprep.mubr.bf16.mxu0 %v1749_v1  ;;  %1682 = vmatprep.mubr.msk.bf16.mxu1 %vm1750_vm0, %v1748_v0 }
  0xe2   : > { %1609 = vmatmul.mubr.msk.bf16.vlgmr.msra.gmra.mrb[32].mxu0 %vm411_vm3, %v380_v41  ;;  %1683 = vmatmul.mubr.msk.bf16.vlgmr.msra.gmra.mrb[32].mxu1 %vm411_vm3, %v380_v41 }
 0x175   : > { %v459_v42 = vpop.f32.mrb[0].mxu0  ;;  %v500_v43 = vpop.f32.mrb[0].mxu1 }
 0x176   : > { %v461_v44 = vpop.f32.mrb[1].mxu0  ;;  %v1636_v45 = vpop.f32.mrb[1].mxu1 }
 0x177   : > { %v463_v46 = vpop.f32.mrb[2].mxu0  ;;  %v503_v47 = vpop.f32.mrb[2].mxu1 }
 0x178   : > { %v464_v48 = vpop.f32.mrb[3].mxu0  ;;  %v1637_v49 = vpop.f32.mrb[3].mxu1 }
 0x17d   : > { %v552_v50 = vpop.f32.mrb[4].mxu0  ;;  %v593_v1 = vpop.f32.mrb[4].mxu1 }
 0x17e   : > { %v553_v51 = vadd.f32 %v552_v50, %v459_v42  ;;  %v594_v52 = vadd.f32 %v593_v1, %v500_v43  ;;  %v554_v0 = vpop.f32.mrb[5].mxu0  ;;  %v1642_v53 = vpop.f32.mrb[5].mxu1 }
 0x17f   : > { %v555_v54 = vadd.f32 %v554_v0, %v461_v44  ;;  %v556_v26 = vpop.f32.mrb[6].mxu0  ;;  %v596_v55 = vpop.f32.mrb[6].mxu1 }
 0x180   : > { %v557_v56 = vpop.f32.mrb[7].mxu0  ;;  %v1643_v57 = vpop.f32.mrb[7].mxu1 }
 0x185   : > { %v673_v58 = vpop.f32.mrb[8].mxu0  ;;  %v714_v59 = vpop.f32.mrb[8].mxu1 }
 0x186   : > { %v720_v60 = vadd.f32 %v673_v58, %v553_v51  ;;  %v722_v61 = vadd.f32 %v714_v59, %v594_v52  ;;  %v675_v62 = vpop.f32.mrb[9].mxu0  ;;  %v1648_v63 = vpop.f32.mrb[9].mxu1 }
 0x187   : > { %v721_v10 = vadd.f32 %v675_v62, %v555_v54  ;;  %v677_v2 = vpop.f32.mrb[10].mxu0  ;;  %v717_v3 = vpop.f32.mrb[10].mxu1 }
 0x188   : > { %v678_v4 = vpop.f32.mrb[11].mxu0  ;;  %v1649_v5 = vpop.f32.mrb[11].mxu1 }
 0x18d   : > { %v797_v7 = vpop.f32.mrb[12].mxu0  ;;  %v838_v8 = vpop.f32.mrb[12].mxu1 }
 0x18e   : > { %v844_v11 = vadd.f32 %v797_v7, %v720_v60  ;;  %v846_v12 = vadd.f32 %v838_v8, %v722_v61  ;;  %v799_v14 = vpop.f32.mrb[13].mxu0  ;;  %v1654_v15 = vpop.f32.mrb[13].mxu1 }
 0x18f   : > { %v845_v16 = vadd.f32 %v799_v14, %v721_v10  ;;  %v801_v17 = vpop.f32.mrb[14].mxu0  ;;  %v841_v19 = vpop.f32.mrb[14].mxu1 }
 0x190   : > { %v802_v20 = vpop.f32.mrb[15].mxu0  ;;  %v1655_v21 = vpop.f32.mrb[15].mxu1 }
 0x191   : > { %v1471_v60 = vpop.permute.xlu0 %1470 }
 0x195   : > { %v921_v13 = vpop.f32.mrb[16].mxu0  ;;  %v962_v23 = vpop.f32.mrb[16].mxu1 }
 0x196   : > { %v968_v9 = vadd.f32 %v921_v13, %v844_v11  ;;  %v970_v6 = vadd.f32 %v962_v23, %v846_v12  ;;  %v923_v24 = vpop.f32.mrb[17].mxu0  ;;  %v1660_v25 = vpop.f32.mrb[17].mxu1 }
 0x197   : > { %v969_v18 = vadd.f32 %v923_v24, %v845_v16  ;;  %v925_v27 = vpop.f32.mrb[18].mxu0  ;;  %v965_v28 = vpop.f32.mrb[18].mxu1 }
 0x198   : > { %v926_v29 = vpop.f32.mrb[19].mxu0  ;;  %v1661_v30 = vpop.f32.mrb[19].mxu1 }
 0x19d   : > { %v1045_v31 = vpop.f32.mrb[20].mxu0  ;;  %v1086_v32 = vpop.f32.mrb[20].mxu1 }
 0x19e   : > { %v1092_v33 = vadd.f32 %v1045_v31, %v968_v9  ;;  %v1094_v34 = vadd.f32 %v1086_v32, %v970_v6  ;;  %v1047_v35 = vpop.f32.mrb[21].mxu0  ;;  %v1666_v22 = vpop.f32.mrb[21].mxu1 }
 0x19f   : > { %v1093_v36 = vadd.f32 %v1047_v35, %v969_v18  ;;  %v1049_v37 = vpop.f32.mrb[22].mxu0  ;;  %v1089_v38 = vpop.f32.mrb[22].mxu1 }
 0x1a0   : > { %v1050_v39 = vpop.f32.mrb[23].mxu0  ;;  %v1667_v40 = vpop.f32.mrb[23].mxu1 }
 0x1a5   : > { %v1169_v41 = vpop.f32.mrb[24].mxu0  ;;  %v1210_v42 = vpop.f32.mrb[24].mxu1 }
 0x1a6   : > { %v1216_v43 = vadd.f32 %v1169_v41, %v1092_v33  ;;  %v1218_v44 = vadd.f32 %v1210_v42, %v1094_v34  ;;  %v1171_v45 = vpop.f32.mrb[25].mxu0  ;;  %v1672_v46 = vpop.f32.mrb[25].mxu1 }
 0x1a7   : > { %v1217_v47 = vadd.f32 %v1171_v45, %v1093_v36  ;;  %v1173_v48 = vpop.f32.mrb[26].mxu0  ;;  %v1213_v49 = vpop.f32.mrb[26].mxu1 }
 0x1a8   : > { %v1174_v50 = vpop.f32.mrb[27].mxu0  ;;  %v1673_v1 = vpop.f32.mrb[27].mxu1 }
 0x1ad   : > { %v1293_v51 = vpop.f32.mrb[28].mxu0  ;;  %v1334_v52 = vpop.f32.mrb[28].mxu1 }
 0x1ae   : > { %v1340_v0 = vadd.f32 %v1293_v51, %v1216_v43  ;;  %v1342_v53 = vadd.f32 %v1334_v52, %v1218_v44  ;;  %v1295_v54 = vpop.f32.mrb[29].mxu0  ;;  %v1678_v26 = vpop.f32.mrb[29].mxu1 }
 0x1af   : > { %v1341_v55 = vadd.f32 %v1295_v54, %v1217_v47  ;;  %v1297_v56 = vpop.f32.mrb[30].mxu0  ;;  %v1337_v57 = vpop.f32.mrb[30].mxu1 }
 0x1b0   : > { %v1298_v58 = vpop.f32.mrb[31].mxu0  ;;  %v1679_v59 = vpop.f32.mrb[31].mxu1 }
 0x1b5   : > { %v1417_v61 = vpop.f32.mrb[32].mxu0  ;;  %v1458_v62 = vpop.f32.mrb[32].mxu1 }
 0x1b6   : > { %v1464_v63 = vadd.f32 %v1417_v61, %v1340_v0  ;;  %v1466_v10 = vadd.f32 %v1458_v62, %v1342_v53  ;;  %v1419_v2 = vpop.f32.mrb[33].mxu0  ;;  %v1684_v3 = vpop.f32.mrb[33].mxu1 }
 0x1b7   : > { %v1465_v4 = vadd.f32 %v1419_v2, %v1341_v55  ;;  %v1421_v5 = vpop.f32.mrb[34].mxu0  ;;  %v1461_v7 = vpop.f32.mrb[34].mxu1 }
 0x1b8   : > { %v1473_v8 = vadd.f32 %v1471_v60, %v1464_v63  ;;  %v1475_v11 = vadd.f32 %v1471_v60, %v1466_v10  ;;  %v1422_v12 = vpop.f32.mrb[35].mxu0  ;;  %v1685_v14 = vpop.f32.mrb[35].mxu1 }
 0x1b9   : > { %v1474_v15 = vadd.f32 %v1471_v60, %v1465_v4 }
 0x1ba   : > { %1476 = vst [vmem:[%s238_s28] sm:$0xff] %v1473_v8  ;;  %1478 = vst [vmem:[%s238_s28 + $0x10] sm:$0xff] %v1475_v11 }
 0x1bb   : > { %1477 = vst [vmem:[%s238_s28 + $0x8] sm:$0xff] %v1474_v15 }
 0x1bc PF: > { %s16_s18 = sadd.s32 1, %s1745_s18  }
 0x1bd   : > { %p13_p1 = scmp.ge.s32.totalorder %s16_s18, 4  }
 0x1bf   :  { %15 = sbr.rel (!%p13_p1) target bundleno = 1 (0x1), region = 78 }
 0x1c6   :  { %1500 = vsyncpa [#allocation3], 1 }
 0x1c7   :  { %1502 = vsyncpa [#allocation3 + $0x1], 1 }

</bundles_post_ra>
